<compile_context>
chip_gen: v5e
topology: v5e:2x2
jax: 0.10.0
libtpu: 0.0.40
codegen_flags: <defaults>
</compile_context>

<pallas_src>
import functools

import jax
import jax.numpy as jnp
from jax import lax
from jax.experimental import pallas as pl
from jax.experimental.pallas import tpu as pltpu

GROWTH = 32                      # densenet201 growth rate
BN_WIDTH = 4 * GROWTH            # bottleneck width = 128
INIT_FEATURES = 64
BLOCK_CONFIG = (6, 12, 48, 32)   # densenet201
BN_EPS = 1e-5
KT = 256                         # K tile for 1x1 convs (matches v6e/v7x 256-deep MXU)
STEM_K = 256                     # 7*7*3 = 147 im2col width, zero-padded to 256


def _round_up(x, m):
    return (x + m - 1) // m * m


def _vmem_limit_bytes():
    # generation-dependent limit: ~75% of physical VMEM, capped at 100 MiB
    # (v5e/v6e: 128 MiB physical, v7x: 64 MiB).  Fall back to a v7x-safe 48 MiB.
    try:
        cap = int(pltpu.get_tpu_info().vmem_capacity_bytes)
        return int(min(100 * 1024 * 1024, cap * 3 // 4))
    except Exception:
        return 48 * 1024 * 1024


VMEM_LIMIT = _vmem_limit_bytes()


def _cp(sems):
    return pltpu.CompilerParams(dimension_semantics=sems, vmem_limit_bytes=VMEM_LIMIT)


_TAPS = tuple((dy, dx) for dy in range(3) for dx in range(3))


# --------------------------- Pallas kernels ---------------------------------

def _dense_layer_kernel(meta_ref, x_ref, s1_ref, b1_ref, w1_ref, s2_ref, b2_ref,
                        w2_ref, cur_ref, o_ref, acc_ref, *, h_sp, w_sp):
    """One DenseNet layer, fully fused, for one image:

    norm1 -> relu -> conv1 (1x1, K-tiled over valid concat channels only)
          -> norm2 -> relu -> conv2 (3x3, 9 shifted matmuls with boundary masks)
          -> merge the GROWTH new channels into the existing 128-wide buffer tile.
    meta = [valid K tiles, 128-tile index of the write slot, lane offset of the write slot].
    """
    k = pl.program_id(1)
    hw = h_sp * w_sp

    @pl.when(k == 0)
    def _():
        acc_ref[...] = jnp.zeros_like(acc_ref)

    @pl.when(k < meta_ref[0])           # skip K tiles past this layer's real input channels
    def _():
        # bf16 BN+ReLU on the VPU, f32 MXU accumulation.
        h = jnp.maximum(x_ref[0] * s1_ref[...] + b1_ref[...], 0)
        acc_ref[...] += jnp.dot(h, w1_ref[...], preferred_element_type=jnp.float32)

    @pl.when(k == pl.num_programs(1) - 1)
    def _():
        # norm2 -> relu on the bottleneck output (f32), all of it resident in VMEM.
        h32 = jnp.maximum(acc_ref[...] * s2_ref[...] + b2_ref[...], 0.0)   # (hw, 128) f32
        row = lax.broadcasted_iota(jnp.int32, (hw, 1), 0)
        col = row % w_sp
        acc2 = jnp.zeros((hw, 128), jnp.float32)
        # 3x3 conv, pad=1: each tap is a flat row shift of the per-image (hw, 128) activation.
        for t, (dy, dx) in enumerate(_TAPS):
            s = (dy - 1) * w_sp + (dx - 1)
            r = (-s) % hw
            shifted = h32 if r == 0 else pltpu.roll(h32, r, axis=0)
            c = jnp.dot(shifted.astype(jnp.bfloat16), w2_ref[t],
                        preferred_element_type=jnp.float32)                # (hw, 128)
            if dy == 1 and dx == 1:
                acc2 = acc2 + c
                continue
            valid = (row + s >= 0) & (row + s < hw)
            if dx == 0:
                valid = valid & (col > 0)
            elif dx == 2:
                valid = valid & (col < w_sp - 1)
            acc2 = acc2 + jnp.where(valid, c, 0.0)
        # conv2 weights were pre-placed into lanes [lo, lo+GROWTH); merge with the existing
        # contents of the target 128-wide tile of the concat buffer -> lane-dense output.
        lane = lax.broadcasted_iota(jnp.int32, (hw, 128), 1)
        lo = meta_ref[2]
        is_new = (lane >= lo) & (lane < lo + GROWTH)
        o_ref[0] = jnp.where(is_new, acc2.astype(o_ref.dtype), cur_ref[0])


def _matmul_bn_relu_kernel(x_ref, w_ref, s_ref, b_ref, o_ref):
    acc = jnp.dot(x_ref[...], w_ref[...], preferred_element_type=jnp.float32)
    o_ref[...] = jnp.maximum(acc * s_ref[...] + b_ref[...], 0.0).astype(o_ref.dtype)


def _max_reduce_kernel(x_ref, o_ref):        # x: (K, t, C) -> elementwise max over K
    acc = x_ref[0]
    for i in range(1, x_ref.shape[0]):
        acc = jnp.maximum(acc, x_ref[i])
    o_ref[...] = acc


def _transition_kernel(x_ref, s_ref, b_ref, w_ref, o_ref, acc_ref):
    """Fused norm -> relu -> 2x2 avg pool -> 1x1 conv (pool commutes with the 1x1 conv)."""
    k = pl.program_id(1)

    @pl.when(k == 0)
    def _():
        acc_ref[...] = jnp.zeros_like(acc_ref)

    s = s_ref[...]
    b = b_ref[...]
    h = jnp.maximum(x_ref[0] * s + b, 0)               # bf16 VPU math
    for t in range(1, x_ref.shape[0]):
        h = h + jnp.maximum(x_ref[t] * s + b, 0)
    h = h * jnp.bfloat16(0.25)
    acc_ref[...] += jnp.dot(h, w_ref[...], preferred_element_type=jnp.float32)

    @pl.when(k == pl.num_programs(1) - 1)
    def _():
        o_ref[...] = acc_ref[...].astype(o_ref.dtype)


def _bn_gap_kernel(x_ref, s_ref, b_ref, o_ref):        # (N, HW, C) -> (N, C), single step
    inv = 1.0 / x_ref.shape[1]
    m = jnp.sum(x_ref[...].astype(jnp.float32), axis=1) * inv
    o_ref[...] = m * s_ref[...] + b_ref[...]           # norm5, no ReLU (matches spec module)


# --------------------------- pallas_call wrappers ----------------------------

def dense_layer(meta, buf, s1, b1, w1, s2, b2, w2, h_sp, w_sp):
    """buf: (N, HW, Cbuf) bf16 running concat; returns the merged (N, HW, 128) tile."""
    n, hw, cbuf = buf.shape
    nkt = cbuf // KT
    kernel = functools.partial(_dense_layer_kernel, h_sp=h_sp, w_sp=w_sp)
    return pl.pallas_call(
        kernel,
        out_shape=jax.ShapeDtypeStruct((n, hw, 128), jnp.bfloat16),
        grid_spec=pltpu.PrefetchScalarGridSpec(
            num_scalar_prefetch=1,
            grid=(n, nkt),
            in_specs=[
                pl.BlockSpec((1, hw, KT), lambda i, k, m: (i, 0, jnp.minimum(k, m[0] - 1))),
                pl.BlockSpec((1, KT), lambda i, k, m: (0, jnp.minimum(k, m[0] - 1))),
                pl.BlockSpec((1, KT), lambda i, k, m: (0, jnp.minimum(k, m[0] - 1))),
                pl.BlockSpec((KT, 128), lambda i, k, m: (jnp.minimum(k, m[0] - 1), 0)),
                pl.BlockSpec((1, 128), lambda i, k, m: (0, 0)),
                pl.BlockSpec((1, 128), lambda i, k, m: (0, 0)),
                pl.BlockSpec((9, 128, 128), lambda i, k, m: (0, 0, 0)),
                pl.BlockSpec((1, hw, 128), lambda i, k, m: (i, 0, m[1])),   # existing tile
            ],
            out_specs=pl.BlockSpec((1, hw, 128), lambda i, k, m: (i, 0, 0)),
            scratch_shapes=[pltpu.VMEM((hw, 128), jnp.float32)],
        ),
        compiler_params=_cp(("parallel", "arbitrary")),
    )(meta, buf, s1, b1, w1, s2, b2, w2, buf)


def matmul_bn_relu(x, w, s, b):
    p, cin = x.shape
    cout = w.shape[1]
    t = min(512, p)
    return pl.pallas_call(
        _matmul_bn_relu_kernel,
        out_shape=jax.ShapeDtypeStruct((p, cout), jnp.bfloat16),
        grid=(pl.cdiv(p, t),),
        in_specs=[pl.BlockSpec((t, cin), lambda i: (i, 0)),
                  pl.BlockSpec((cin, cout), lambda i: (0, 0)),
                  pl.BlockSpec((1, cout), lambda i: (0, 0)),
                  pl.BlockSpec((1, cout), lambda i: (0, 0))],
        out_specs=pl.BlockSpec((t, cout), lambda i: (i, 0)),
        compiler_params=_cp(("parallel",)),
    )(x, w, s, b)


def max_reduce(stacked):   # (K, P, C) -> (P, C)
    k_, p, c = stacked.shape
    t = min(128, p)
    return pl.pallas_call(
        _max_reduce_kernel,
        out_shape=jax.ShapeDtypeStruct((p, c), stacked.dtype),
        grid=(pl.cdiv(p, t),),
        in_specs=[pl.BlockSpec((k_, t, c), lambda i: (0, i, 0))],
        out_specs=pl.BlockSpec((t, c), lambda i: (i, 0)),
        compiler_params=_cp(("parallel",)),
    )(stacked)


def transition_pool_matmul(taps, s, b, w):
    """taps: (4, Pout, Cin) bf16 -> (Pout, Cout) bf16, K-tiled at 256."""
    _, p, cin = taps.shape
    cout = w.shape[1]
    t = min(256, p)
    grid = (pl.cdiv(p, t), cin // KT)
    return pl.pallas_call(
        _transition_kernel,
        out_shape=jax.ShapeDtypeStruct((p, cout), jnp.bfloat16),
        grid=grid,
        in_specs=[pl.BlockSpec((4, t, KT), lambda i, k: (0, i, k)),
                  pl.BlockSpec((1, KT), lambda i, k: (0, k)),
                  pl.BlockSpec((1, KT), lambda i, k: (0, k)),
                  pl.BlockSpec((KT, cout), lambda i, k: (k, 0))],
        out_specs=pl.BlockSpec((t, cout), lambda i, k: (i, 0)),
        scratch_shapes=[pltpu.VMEM((t, cout), jnp.float32)],
        compiler_params=_cp(("parallel", "arbitrary")),
    )(taps, s, b, w)


def bn_gap(x, s, b):       # (N, HW, C) bf16 -> (N, C) f32 in a single grid step
    n, hw, c = x.shape
    return pl.pallas_call(
        _bn_gap_kernel,
        out_shape=jax.ShapeDtypeStruct((n, c), jnp.float32),
        grid=(1,),
        in_specs=[pl.BlockSpec((n, hw, c), lambda i: (0, 0, 0)),
                  pl.BlockSpec((1, c), lambda i: (0, 0)),
                  pl.BlockSpec((1, c), lambda i: (0, 0))],
        out_specs=pl.BlockSpec((n, c), lambda i: (0, 0)),
        compiler_params=_cp(("arbitrary",)),
    )(x, s, b)


# --------------------------- glue (stem, blocks, transitions, head) ----------

@jax.jit
def stem_forward(x_nchw, w0, s0, b0):
    """conv0 7x7/s2/p3 (+norm0+relu0 fused) -> maxpool 3x3/s2/p1 -> (N, HW, 64) bf16."""
    x = jnp.transpose(x_nchw, (0, 2, 3, 1)).astype(jnp.bfloat16)   # NCHW -> NHWC
    n, h, w, c = x.shape
    ho, wo = h // 2, w // 2
    xp = jnp.pad(x, ((0, 0), (3, 3), (3, 3), (0, 0)))
    cols = [xp[:, dy:dy + 2 * ho:2, dx:dx + 2 * wo:2, :]
            for dy in range(7) for dx in range(7)]
    pat = jnp.concatenate(cols, axis=-1).reshape(n * ho * wo, 49 * c)
    pat = jnp.pad(pat, ((0, 0), (0, STEM_K - 49 * c)))             # K 147 -> 256
    y = matmul_bn_relu(pat, w0, s0, b0).reshape(n, ho, wo, INIT_FEATURES)
    hp, wp = ho // 2, wo // 2
    yp = jnp.pad(y, ((0, 0), (1, 1), (1, 1), (0, 0)), constant_values=-jnp.inf)
    taps = [yp[:, dy:dy + 2 * hp:2, dx:dx + 2 * wp:2, :].reshape(n * hp * wp, INIT_FEATURES)
            for dy in range(3) for dx in range(3)]
    stacked = jnp.stack(taps, axis=0)
    p_pool = stacked.shape[1]
    if p_pool % 2 == 0:
        # lane-dense maxpool: pack two 64-channel rows per 128-lane vreg row (max is elementwise).
        out = max_reduce(stacked.reshape(9, p_pool // 2, 2 * INIT_FEATURES))
        out = out.reshape(p_pool, INIT_FEATURES)
    else:
        out = max_reduce(stacked)
    return out.reshape(n, hp * wp, INIT_FEATURES)


def make_block_fn(h_sp, w_sp):
    """One jitted executable per dense block: lax.scan over stacked per-layer params."""
    def run(buf, stacked):
        def body(b, lp):
            meta, s1, b1, w1, s2, b2, w2 = lp
            tile = dense_layer(meta, b, s1, b1, w1, s2, b2, w2, h_sp, w_sp)
            start = (jnp.int32(0), jnp.int32(0), meta[1] * jnp.int32(128))
            b = lax.dynamic_update_slice(b, tile, start)   # 128-aligned, in-place w/ donation
            return b, None
        buf, _ = lax.scan(body, buf, stacked)
        return buf
    return jax.jit(run, donate_argnums=(0,))


def _transition_impl(x_flat, s, b, w, h_sp, w_sp):
    n, hw, c = x_flat.shape
    x = x_flat.reshape(n, h_sp, w_sp, c)
    hp, wp = h_sp // 2, w_sp // 2
    taps = jnp.stack([x[:, dy::2, dx::2, :].reshape(n * hp * wp, c)
                      for dy in range(2) for dx in range(2)], axis=0)
    y = transition_pool_matmul(taps, s, b, w)
    return y.reshape(n, hp * wp, c // 2)


transition = jax.jit(_transition_impl, static_argnums=(4, 5))


@jax.jit
def head(x, s5, b5):
    """norm5 -> adaptive_avg_pool2d((1,1)) -> flatten (no ReLU: spec uses .features only)."""
    return bn_gap(x, s5, b5)


# --------------------------- parameters --------------------------------------

def make_bn(key, c, dtype=jnp.float32):
    k1, k2, k3, k4 = jax.random.split(key, 4)
    gamma = 1.0 + 0.05 * jax.random.normal(k1, (c,), jnp.float32)
    beta = 0.05 * jax.random.normal(k2, (c,), jnp.float32)
    mean = 0.05 * jax.random.normal(k3, (c,), jnp.float32)
    var = 1.0 + 0.05 * jax.random.uniform(k4, (c,), jnp.float32)
    scale = gamma * jax.lax.rsqrt(var + BN_EPS)            # folded eval-mode BN
    bias = beta - mean * scale
    return scale.reshape(1, c).astype(dtype), bias.reshape(1, c).astype(dtype)


def make_conv(key, fan_in, shape):
    return jax.random.normal(key, shape, jnp.float32) * (2.0 / fan_in) ** 0.5


def init_params(key):
    keys = iter(jax.random.split(key, 2048))
    nxt = lambda: next(keys)
    p = {}
    # stem conv0: (7,7,3,64) in (dy, dx, cin) im2col order, K padded 147 -> 256
    w0 = make_conv(nxt(), 3 * 49, (7, 7, 3, INIT_FEATURES)).reshape(7 * 7 * 3, INIT_FEATURES)
    p["w0"] = jnp.pad(w0, ((0, STEM_K - 7 * 7 * 3), (0, 0))).astype(jnp.bfloat16)
    p["s0"], p["b0"] = make_bn(nxt(), INIT_FEATURES)
    blocks, trans = [], []
    c = INIT_FEATURES
    for bi, nlayers in enumerate(BLOCK_CONFIG):
        cfin = c + nlayers * GROWTH
        cbuf = _round_up(cfin, KT)                         # 256 / 512 / 1792 / 2048
        metas, s1s, b1s, w1s, s2s, b2s, w2s = [], [], [], [], [], [], []
        for li in range(nlayers):
            cin = c + li * GROWTH
            off = cin                                      # write offset for this layer
            lo = off % 128
            s1, b1 = make_bn(nxt(), cin, jnp.bfloat16)
            s1s.append(jnp.pad(s1, ((0, 0), (0, cbuf - cin))))
            b1s.append(jnp.pad(b1, ((0, 0), (0, cbuf - cin))))
            w1s.append(jnp.pad(make_conv(nxt(), cin, (cin, BN_WIDTH)),
                               ((0, cbuf - cin), (0, 0))).astype(jnp.bfloat16))
            s2, b2 = make_bn(nxt(), BN_WIDTH)
            s2s.append(s2)
            b2s.append(b2)
            w2 = make_conv(nxt(), 9 * BN_WIDTH, (9, BN_WIDTH, GROWTH))
            w2p = jnp.zeros((9, BN_WIDTH, 128), jnp.float32)
            w2p = w2p.at[:, :, lo:lo + GROWTH].set(w2)     # pre-place output lanes
            w2s.append(w2p.astype(jnp.bfloat16))
            metas.append(jnp.array([(cin + KT - 1) // KT, off // 128, lo], jnp.int32))
        blocks.append(tuple(jnp.stack(a, axis=0)
                            for a in (metas, s1s, b1s, w1s, s2s, b2s, w2s)))
        c = cfin
        if bi < len(BLOCK_CONFIG) - 1:
            st, bt = make_bn(nxt(), c, jnp.bfloat16)
            wt = make_conv(nxt(), c, (c, c // 2)).astype(jnp.bfloat16)
            trans.append((st, bt, wt))
            c = c // 2
    p["blocks"] = blocks
    p["trans"] = trans
    s5, b5 = make_bn(nxt(), c)                             # c == 1920
    cpad = _round_up(c, KT)                                # 2048 (block-4 buffer padding)
    p["s5"] = jnp.pad(s5, ((0, 0), (0, cpad - c)))
    p["b5"] = jnp.pad(b5, ((0, 0), (0, cpad - c)))
    p["out_features"] = c
    return p


# --------------------------- full forward ------------------------------------

def densenet_feature_extractor(x_nchw, params):
    n, _, hin, win = x_nchw.shape
    y = stem_forward(x_nchw, params["w0"], params["s0"], params["b0"])   # (N, HW, 64) bf16
    h_sp, w_sp = hin // 4, win // 4
    c = INIT_FEATURES
    for bi, nlayers in enumerate(BLOCK_CONFIG):
        cfin = c + nlayers * GROWTH
        cbuf = _round_up(cfin, KT)
        buf = jnp.pad(y, ((0, 0), (0, 0), (0, cbuf - c)))  # zero-filled future channels
        buf = make_block_fn(h_sp, w_sp)(buf, params["blocks"][bi])
        if bi < len(params["trans"]):
            st, bt, wt = params["trans"][bi]
            y = transition(buf[:, :, :cfin], st, bt, wt, h_sp, w_sp)
            h_sp //= 2
            w_sp //= 2
            c = cfin // 2
        else:
            y = buf                                        # padded (N, HW, 2048)
    out = head(y, params["s5"], params["b5"])              # (N, 2048) f32
    return out[:, :params["out_features"]]                 # (N, 1920)


if __name__ == "__main__":
    key = jax.random.PRNGKey(0)
    pkey, xkey = jax.random.split(key)
    params = init_params(pkey)
    # small input: batch=2, 3 channels, 64x64 spatial (densenet downsamples by 32 -> 2x2 final)
    x = jax.random.normal(xkey, (2, 3, 64, 64), jnp.float32)   # NCHW, like PyTorch
    out = densenet_feature_extractor(x, params)
    out = jax.block_until_ready(out)
    assert out.shape == (2, 1920), out.shape
    assert bool(jnp.all(jnp.isfinite(out)))
    print("KERNEL_OK")
</pallas_src>

<mosaic_0001>
module attributes {stable_mosaic.version = 11 : i64} {
  func.func @_matmul_bn_relu_kernel(%arg0: i32, %arg1: memref<512x256xbf16, #tpu.memory_space<vmem>>, %arg2: memref<256x64xbf16, #tpu.memory_space<vmem>>, %arg3: memref<1x64xf32, #tpu.memory_space<vmem>>, %arg4: memref<1x64xf32, #tpu.memory_space<vmem>>, %arg5: memref<512x64xbf16, #tpu.memory_space<vmem>>) attributes {dimension_semantics = [#tpu.dimension_semantics<parallel>], iteration_bounds = array<i64: 4>, scalar_prefetch = 0 : i64, scratch_operands = 0 : i64, tpu.core_type = #tpu.core_type<tc>, window_params = [{transform_indices = @transform_0, window_bounds = array<i64: 512, 256>}, {pipeline_mode = #tpu.pipeline_mode<synchronous>, transform_indices = @transform_1, window_bounds = array<i64: 256, 64>}, {pipeline_mode = #tpu.pipeline_mode<synchronous>, transform_indices = @transform_2, window_bounds = array<i64: 1, 64>}, {pipeline_mode = #tpu.pipeline_mode<synchronous>, transform_indices = @transform_3, window_bounds = array<i64: 1, 64>}, {transform_indices = @transform_4, window_bounds = array<i64: 512, 64>}]} {
    %c0 = arith.constant 0 : index
    %c0_0 = arith.constant 0 : index
    %0 = vector.load %arg1[%c0, %c0_0] : memref<512x256xbf16, #tpu.memory_space<vmem>>, vector<512x256xbf16>
    %c0_1 = arith.constant 0 : index
    %c0_2 = arith.constant 0 : index
    %1 = vector.load %arg2[%c0_1, %c0_2] : memref<256x64xbf16, #tpu.memory_space<vmem>>, vector<256x64xbf16>
    %cst = arith.constant dense<0.000000e+00> : vector<512x64xf32>
    %2 = tpu.matmul %0, %1, %cst {dimension_numbers = #tpu.dot_dimension_numbers<[1], [0], [0], [1], [0, 0, 1, 1], [], []>} : vector<512x256xbf16>, vector<256x64xbf16>, vector<512x64xf32> -> vector<512x64xf32>
    %c0_3 = arith.constant 0 : index
    %c0_4 = arith.constant 0 : index
    %3 = vector.load %arg3[%c0_3, %c0_4] : memref<1x64xf32, #tpu.memory_space<vmem>>, vector<1x64xf32>
    %4 = vector.broadcast %3 : vector<1x64xf32> to vector<512x64xf32>
    %5 = arith.mulf %2, %4 : vector<512x64xf32>
    %c0_5 = arith.constant 0 : index
    %c0_6 = arith.constant 0 : index
    %6 = vector.load %arg4[%c0_5, %c0_6] : memref<1x64xf32, #tpu.memory_space<vmem>>, vector<1x64xf32>
    %7 = vector.broadcast %6 : vector<1x64xf32> to vector<512x64xf32>
    %8 = arith.addf %5, %7 : vector<512x64xf32>
    %cst_7 = arith.constant 0.000000e+00 : f32
    %9 = vector.broadcast %cst_7 : f32 to vector<512x64xf32>
    %10 = arith.maximumf %8, %9 : vector<512x64xf32>
    %11 = arith.truncf %10 : vector<512x64xf32> to vector<512x64xbf16>
    %c0_8 = arith.constant 0 : index
    %c0_9 = arith.constant 0 : index
    %12 = vector.load %arg5[%c0_8, %c0_9] : memref<512x64xbf16, #tpu.memory_space<vmem>>, vector<512x64xbf16>
    tpu.vector_store %arg5[%c0_8, %c0_9], %11 {strides = array<i32>} : memref<512x64xbf16, #tpu.memory_space<vmem>>, vector<512x64xbf16>,
    return
  }
  func.func @transform_0(%arg0: i32) -> (i32, i32) {
    %c0_i32 = arith.constant 0 : i32
    %c0_i32_0 = arith.constant 0 : i32
    return %arg0, %c0_i32 : i32, i32
  }
  func.func @transform_1(%arg0: i32) -> (i32, i32) {
    %c0_i32 = arith.constant 0 : i32
    %c0_i32_0 = arith.constant 0 : i32
    %c0_i32_1 = arith.constant 0 : i32
    return %c0_i32, %c0_i32_0 : i32, i32
  }
  func.func @transform_2(%arg0: i32) -> (i32, i32) {
    %c0_i32 = arith.constant 0 : i32
    %c0_i32_0 = arith.constant 0 : i32
    %c0_i32_1 = arith.constant 0 : i32
    return %c0_i32, %c0_i32_0 : i32, i32
  }
  func.func @transform_3(%arg0: i32) -> (i32, i32) {
    %c0_i32 = arith.constant 0 : i32
    %c0_i32_0 = arith.constant 0 : i32
    %c0_i32_1 = arith.constant 0 : i32
    return %c0_i32, %c0_i32_0 : i32, i32
  }
  func.func @transform_4(%arg0: i32) -> (i32, i32) {
    %c0_i32 = arith.constant 0 : i32
    %c0_i32_0 = arith.constant 0 : i32
    return %arg0, %c0_i32 : i32, i32
  }
}

module attributes {stable_mosaic.version = 11 : i64} {
  func.func @_max_reduce_kernel(%arg0: i32, %arg1: memref<9x128x128xbf16, #tpu.memory_space<vmem>>, %arg2: memref<128x128xbf16, #tpu.memory_space<vmem>>) attributes {dimension_semantics = [#tpu.dimension_semantics<parallel>], iteration_bounds = array<i64: 2>, scalar_prefetch = 0 : i64, scratch_operands = 0 : i64, tpu.core_type = #tpu.core_type<tc>, window_params = [{transform_indices = @transform_0, window_bounds = array<i64: 9, 128, 128>}, {transform_indices = @transform_1, window_bounds = array<i64: 128, 128>}]} {
    %c0 = arith.constant 0 : index
    %c0_0 = arith.constant 0 : index
    %c0_1 = arith.constant 0 : index
    %0 = vector.load %arg1[%c0, %c0_0, %c0_1] : memref<9x128x128xbf16, #tpu.memory_space<vmem>>, vector<1x128x128xbf16>
    %1 = vector.shape_cast %0 : vector<1x128x128xbf16> to vector<128x128xbf16>
    %c1 = arith.constant 1 : index
    %c0_2 = arith.constant 0 : index
    %c0_3 = arith.constant 0 : index
    %2 = vector.load %arg1[%c1, %c0_2, %c0_3] : memref<9x128x128xbf16, #tpu.memory_space<vmem>>, vector<1x128x128xbf16>
    %3 = vector.shape_cast %2 : vector<1x128x128xbf16> to vector<128x128xbf16>
    %4 = arith.maximumf %1, %3 : vector<128x128xbf16>
    %c2 = arith.constant 2 : index
    %c0_4 = arith.constant 0 : index
    %c0_5 = arith.constant 0 : index
    %5 = vector.load %arg1[%c2, %c0_4, %c0_5] : memref<9x128x128xbf16, #tpu.memory_space<vmem>>, vector<1x128x128xbf16>
    %6 = vector.shape_cast %5 : vector<1x128x128xbf16> to vector<128x128xbf16>
    %7 = arith.maximumf %4, %6 : vector<128x128xbf16>
    %c3 = arith.constant 3 : index
    %c0_6 = arith.constant 0 : index
    %c0_7 = arith.constant 0 : index
    %8 = vector.load %arg1[%c3, %c0_6, %c0_7] : memref<9x128x128xbf16, #tpu.memory_space<vmem>>, vector<1x128x128xbf16>
    %9 = vector.shape_cast %8 : vector<1x128x128xbf16> to vector<128x128xbf16>
    %10 = arith.maximumf %7, %9 : vector<128x128xbf16>
    %c4 = arith.constant 4 : index
    %c0_8 = arith.constant 0 : index
    %c0_9 = arith.constant 0 : index
    %11 = vector.load %arg1[%c4, %c0_8, %c0_9] : memref<9x128x128xbf16, #tpu.memory_space<vmem>>, vector<1x128x128xbf16>
    %12 = vector.shape_cast %11 : vector<1x128x128xbf16> to vector<128x128xbf16>
    %13 = arith.maximumf %10, %12 : vector<128x128xbf16>
    %c5 = arith.constant 5 : index
    %c0_10 = arith.constant 0 : index
    %c0_11 = arith.constant 0 : index
    %14 = vector.load %arg1[%c5, %c0_10, %c0_11] : memref<9x128x128xbf16, #tpu.memory_space<vmem>>, vector<1x128x128xbf16>
    %15 = vector.shape_cast %14 : vector<1x128x128xbf16> to vector<128x128xbf16>
    %16 = arith.maximumf %13, %15 : vector<128x128xbf16>
    %c6 = arith.constant 6 : index
    %c0_12 = arith.constant 0 : index
    %c0_13 = arith.constant 0 : index
    %17 = vector.load %arg1[%c6, %c0_12, %c0_13] : memref<9x128x128xbf16, #tpu.memory_space<vmem>>, vector<1x128x128xbf16>
    %18 = vector.shape_cast %17 : vector<1x128x128xbf16> to vector<128x128xbf16>
    %19 = arith.maximumf %16, %18 : vector<128x128xbf16>
    %c7 = arith.constant 7 : index
    %c0_14 = arith.constant 0 : index
    %c0_15 = arith.constant 0 : index
    %20 = vector.load %arg1[%c7, %c0_14, %c0_15] : memref<9x128x128xbf16, #tpu.memory_space<vmem>>, vector<1x128x128xbf16>
    %21 = vector.shape_cast %20 : vector<1x128x128xbf16> to vector<128x128xbf16>
    %22 = arith.maximumf %19, %21 : vector<128x128xbf16>
    %c8 = arith.constant 8 : index
    %c0_16 = arith.constant 0 : index
    %c0_17 = arith.constant 0 : index
    %23 = vector.load %arg1[%c8, %c0_16, %c0_17] : memref<9x128x128xbf16, #tpu.memory_space<vmem>>, vector<1x128x128xbf16>
    %24 = vector.shape_cast %23 : vector<1x128x128xbf16> to vector<128x128xbf16>
    %25 = arith.maximumf %22, %24 : vector<128x128xbf16>
    %c0_18 = arith.constant 0 : index
    %c0_19 = arith.constant 0 : index
    %26 = vector.load %arg2[%c0_18, %c0_19] : memref<128x128xbf16, #tpu.memory_space<vmem>>, vector<128x128xbf16>
    tpu.vector_store %arg2[%c0_18, %c0_19], %25 {strides = array<i32>} : memref<128x128xbf16, #tpu.memory_space<vmem>>, vector<128x128xbf16>,
    return
  }
  func.func @transform_0(%arg0: i32) -> (i32, i32, i32) {
    %c0_i32 = arith.constant 0 : i32
    %c0_i32_0 = arith.constant 0 : i32
    %c0_i32_1 = arith.constant 0 : i32
    return %c0_i32, %arg0, %c0_i32_0 : i32, i32, i32
  }
  func.func @transform_1(%arg0: i32) -> (i32, i32) {
    %c0_i32 = arith.constant 0 : i32
    %c0_i32_0 = arith.constant 0 : i32
    return %arg0, %c0_i32 : i32, i32
  }
}

</mosaic_0001>

<bundles_post_ra>
// kernel: stem_forward.2
= control target key start
LH: loop header
LB: loop body
LE: loop exit
PB: predicated region body
PF: predicated region fallthrough
CT: control target
= control target key end

     0   :  { %s1913_s15 = smov 0   ;;  %s2390_s0 = inlined_call_operand.vmem [shape: bf16[2048,256], index: 0, kind: input, shape index: {}]   ;;  %s2391_s1 = inlined_call_operand.vmem [shape: bf16[256,64], index: 1, kind: input, shape index: {}]   ;;  %s2392_s2 = inlined_call_operand.vmem [shape: f32[1,64], index: 2, kind: input, shape index: {}]   ;;  %s2393_s3 = inlined_call_operand.vmem [shape: f32[1,64], index: 3, kind: input, shape index: {}]   ;;  %s2394_s4 = inlined_call_operand.vmem [shape: bf16[2048,64], index: 4, kind: output, shape index: {}]  }
   0x1 LB: > { %s1439_s16 = sadd.s32 4294967295, %s1886_s15   ;;  %p1443_p0 = scmp.ge.s32.totalorder %s1886_s15, 1  ;;  %s1886_s15 = sphi %s1913_s15, %s14_s15  }
   0x2   : > { %p164_p1 = scmp.lt.s32.totalorder %s1886_s15, 5 }
   0x4   : > { %p165_p2 = pnand %p1443_p0, %p164_p1 }
   0x5   : > { %s1444_s29 = sshll.u32 (!%p165_p2), %s1439_s16, 6 }
   0x6   : > { %168 = sbr.rel (%p165_p2) target bundleno = 435 (0x1b3), region = 36  ;;  %p192_p3 = scmp.lt.s32.totalorder (!%p165_p2), %s1444_s29, 255 }
   0xb   : > { %v1843_v0 = vld [vmem:[%s2391_s1 + $0x38] sm:$0xff]  ;;  %v1842_v2 = vld [vmem:[%s2391_s1 + $0x30] sm:$0xff]  ;;  %v1841_v4 = vld [vmem:[%s2391_s1 + $0x28] sm:$0xff]  ;;  %s2396_s29 = smov (!%p192_p3, %s1444_s29), 255  ;;  %vm1318_vm0 = vcmask 519168  }
   0xc   : > { %v1851_v1 = vld [vmem:[%s2391_s1 + $0x78] sm:$0xff]  ;;  %716 = vmatpush.bf16.msra.mxu0 %v1843_v0  ;;  %1852 = vmatpush.bf16.msra.mxu2 %v1843_v0  ;;  %v1850_v3 = vld [vmem:[%s2391_s1 + $0x70] sm:$0xff]  ;;  %v1849_v5 = vld [vmem:[%s2391_s1 + $0x68] sm:$0xff]  ;;  %s1771_s17 = sshll.u32 %s2396_s29, 3  ;;  %s1448_s8 = sshll.u32 %s2396_s29, 2 }
   0xd   : > { %885 = vmatpush.bf16.msra.mxu1 %v1851_v1  ;;  %1860 = vmatpush.bf16.msra.mxu3 %v1851_v1  ;;  %v1840_v6 = vld [vmem:[%s2391_s1 + $0x20] sm:$0xff]  ;;  %v1839_v8 = vld [vmem:[%s2391_s1 + $0x18] sm:$0xff]  ;;  %v1838_v10 = vld [vmem:[%s2391_s1 + $0x10] sm:$0xff]  ;;  %s1966_s22 = scalar_lea.vmem %s2390_s0, %s1771_s17  ;;  %s2065_s11 = scalar_lea.vmem %s2394_s4, %s1448_s8 }
   0xe   : > { %v1848_v7 = vld [vmem:[%s2391_s1 + $0x60] sm:$0xff]  ;;  %v1847_v9 = vld [vmem:[%s2391_s1 + $0x58] sm:$0xff]  ;;  %v1846_v11 = vld [vmem:[%s2391_s1 + $0x50] sm:$0xff] }
   0xf   : > { %v1837_v12 = vld [vmem:[%s2391_s1 + $0x8] sm:$0xff]  ;;  %v1836_v14 = vld [vmem:[%s2391_s1] sm:$0xff]  ;;  %v1459_v28 = vld [vmem:[%s1966_s22 + $0x10] sm:$0xf] }
  0x10   : > { %717 = vmatpush.bf16.msra.mxu0 %v1842_v2  ;;  %1853 = vmatpush.bf16.msra.mxu2 %v1842_v2  ;;  %v1845_v13 = vld [vmem:[%s2391_s1 + $0x48] sm:$0xff]  ;;  %v1844_v15 = vld [vmem:[%s2391_s1 + $0x40] sm:$0xff]  ;;  %v1775_v29 = vld [vmem:[%s1966_s22 + $0x14] sm:$0xf0] }
  0x11   : > { %886 = vmatpush.bf16.msra.mxu1 %v1850_v3  ;;  %1861 = vmatpush.bf16.msra.mxu3 %v1850_v3  ;;  %v1451_v16 = vld [vmem:[%s1966_s22] sm:$0xf]  ;;  %v1773_v17 = vld [vmem:[%s1966_s22 + $0x4] sm:$0xf0]  ;;  %v1772_v20 = vld [vmem:[%s1966_s22 + $0x4] sm:$0xf]  ;;  %v1460_v36 = vor.u32 %v1775_v29, %v1459_v28 }
  0x12   : > { %v1579_v18 = vld [vmem:[%s1966_s22 + $0x100] sm:$0xf]  ;;  %v1805_v19 = vld [vmem:[%s1966_s22 + $0x104] sm:$0xf0]  ;;  %v1453_v21 = vld [vmem:[%s1966_s22 + $0x8] sm:$0xf0]  ;;  %v1452_v24 = vor.u32 %v1773_v17, %v1451_v16 }
  0x13   : > { %v1804_v22 = vld [vmem:[%s1966_s22 + $0x104] sm:$0xf]  ;;  %v1581_v23 = vld [vmem:[%s1966_s22 + $0x108] sm:$0xf0]  ;;  %v1580_v25 = vor.u32 %v1805_v19, %v1579_v18  ;;  %v1456_v26 = vor.u32 %v1772_v20, %v1453_v21  ;;  %v1587_v30 = vld [vmem:[%s1966_s22 + $0x110] sm:$0xf] }
  0x14   : > { %718 = vmatpush.bf16.msra.mxu0 %v1841_v4  ;;  %1854 = vmatpush.bf16.msra.mxu2 %v1841_v4  ;;  %v1584_v27 = vor.u32 %v1804_v22, %v1581_v23  ;;  %v1807_v31 = vld [vmem:[%s1966_s22 + $0x114] sm:$0xf0]  ;;  %v1774_v32 = vld [vmem:[%s1966_s22 + $0x14] sm:$0xf]  ;;  %v1461_v33 = vld [vmem:[%s1966_s22 + $0x18] sm:$0xf0] }
  0x15   : > { %887 = vmatpush.bf16.msra.mxu1 %v1849_v5  ;;  %1862 = vmatpush.bf16.msra.mxu3 %v1849_v5  ;;  %v1806_v34 = vld [vmem:[%s1966_s22 + $0x114] sm:$0xf]  ;;  %v1589_v35 = vld [vmem:[%s1966_s22 + $0x118] sm:$0xf0]  ;;  %v1588_v37 = vor.u32 %v1807_v31, %v1587_v30  ;;  %v1464_v38 = vor.u32 %v1774_v32, %v1461_v33  ;;  %v1467_v40 = vld [vmem:[%s1966_s22 + $0x20] sm:$0xf] }
  0x16   : > { %v1592_v39 = vor.u32 %v1806_v34, %v1589_v35  ;;  %v1777_v41 = vld [vmem:[%s1966_s22 + $0x24] sm:$0xf0]  ;;  %v1595_v42 = vld [vmem:[%s1966_s22 + $0x120] sm:$0xf]  ;;  %v1776_v44 = vld [vmem:[%s1966_s22 + $0x24] sm:$0xf] }
  0x17   : > { %v1809_v43 = vld [vmem:[%s1966_s22 + $0x124] sm:$0xf0]  ;;  %v1469_v45 = vld [vmem:[%s1966_s22 + $0x28] sm:$0xf0]  ;;  %v1808_v46 = vld [vmem:[%s1966_s22 + $0x124] sm:$0xf]  ;;  %v1468_v48 = vor.u32 %v1777_v41, %v1467_v40 }
  0x18   : > { %719 = vmatpush.bf16.msra.mxu0 %v1840_v6  ;;  %1855 = vmatpush.bf16.msra.mxu2 %v1840_v6  ;;  %v1597_v47 = vld [vmem:[%s1966_s22 + $0x128] sm:$0xf0]  ;;  %v1596_v49 = vor.u32 %v1809_v43, %v1595_v42  ;;  %v1472_v50 = vor.u32 %v1776_v44, %v1469_v45  ;;  %v1475_v52 = vld [vmem:[%s1966_s22 + $0x30] sm:$0xf]  ;;  %v1779_v53 = vld [vmem:[%s1966_s22 + $0x34] sm:$0xf0] }
  0x19   : > { %888 = vmatpush.bf16.msra.mxu1 %v1848_v7  ;;  %1863 = vmatpush.bf16.msra.mxu3 %v1848_v7  ;;  %v1600_v51 = vor.u32 %v1808_v46, %v1597_v47  ;;  %v1603_v54 = vld [vmem:[%s1966_s22 + $0x130] sm:$0xf]  ;;  %v1811_v55 = vld [vmem:[%s1966_s22 + $0x134] sm:$0xf0]  ;;  %v1778_v56 = vld [vmem:[%s1966_s22 + $0x34] sm:$0xf]  ;;  %v1476_v60 = vor.u32 %v1779_v53, %v1475_v52 }
  0x1a   : > { %v1477_v57 = vld [vmem:[%s1966_s22 + $0x38] sm:$0xf0]  ;;  %v1810_v58 = vld [vmem:[%s1966_s22 + $0x134] sm:$0xf]  ;;  %v1604_v61 = vor.u32 %v1811_v55, %v1603_v54  ;;  %v1483_v0 = vld [vmem:[%s1966_s22 + $0x40] sm:$0xf] }
  0x1b   : > { %v1605_v59 = vld [vmem:[%s1966_s22 + $0x138] sm:$0xf0]  ;;  %v1480_v62 = vor.u32 %v1778_v56, %v1477_v57  ;;  %v1781_v1 = vld [vmem:[%s1966_s22 + $0x44] sm:$0xf0]  ;;  %v1611_v2 = vld [vmem:[%s1966_s22 + $0x140] sm:$0xf] }
  0x1c   : > { %720 = vmatpush.bf16.msra.mxu0 %v1839_v8  ;;  %1856 = vmatpush.bf16.msra.mxu2 %v1839_v8  ;;  %v1608_v63 = vor.u32 %v1810_v58, %v1605_v59  ;;  %v1813_v3 = vld [vmem:[%s1966_s22 + $0x144] sm:$0xf0]  ;;  %v1780_v4 = vld [vmem:[%s1966_s22 + $0x44] sm:$0xf]  ;;  %v1485_v5 = vld [vmem:[%s1966_s22 + $0x48] sm:$0xf0]  ;;  %v1484_v8 = vor.u32 %v1781_v1, %v1483_v0 }
  0x1d   : > { %889 = vmatpush.bf16.msra.mxu1 %v1847_v9  ;;  %1864 = vmatpush.bf16.msra.mxu3 %v1847_v9  ;;  %v1812_v6 = vld [vmem:[%s1966_s22 + $0x144] sm:$0xf]  ;;  %v1613_v7 = vld [vmem:[%s1966_s22 + $0x148] sm:$0xf0]  ;;  %v1612_v9 = vor.u32 %v1813_v3, %v1611_v2  ;;  %v1782_v16 = vld [vmem:[%s1966_s22 + $0x54] sm:$0xf] }
  0x1e   : > { %v1493_v17 = vld [vmem:[%s1966_s22 + $0x58] sm:$0xf0]  ;;  %v1814_v18 = vld [vmem:[%s1966_s22 + $0x154] sm:$0xf]  ;;  %v1784_v28 = vld [vmem:[%s1966_s22 + $0x64] sm:$0xf] }
  0x1f   : > { %v1621_v19 = vld [vmem:[%s1966_s22 + $0x158] sm:$0xf0]  ;;  %v1496_v22 = vor.u32 %v1782_v16, %v1493_v17  ;;  %v1501_v29 = vld [vmem:[%s1966_s22 + $0x68] sm:$0xf0]  ;;  %v1816_v30 = vld [vmem:[%s1966_s22 + $0x164] sm:$0xf] }
  0x20   : > { %721 = vmatpush.bf16.msra.mxu0 %v1838_v10  ;;  %1857 = vmatpush.bf16.msra.mxu2 %v1838_v10  ;;  %v1488_v10 = vor.u32 %v1780_v4, %v1485_v5  ;;  %v1624_v23 = vor.u32 %v1814_v18, %v1621_v19  ;;  %v1629_v31 = vld [vmem:[%s1966_s22 + $0x168] sm:$0xf0]  ;;  %v1504_v34 = vor.u32 %v1784_v28, %v1501_v29  ;;  %v1786_v40 = vld [vmem:[%s1966_s22 + $0x74] sm:$0xf]  ;;  %v1509_v41 = vld [vmem:[%s1966_s22 + $0x78] sm:$0xf0] }
  0x21   : > { %890 = vmatpush.bf16.msra.mxu1 %v1846_v11  ;;  %1865 = vmatpush.bf16.msra.mxu3 %v1846_v11  ;;  %v1616_v11 = vor.u32 %v1812_v6, %v1613_v7  ;;  %v1632_v35 = vor.u32 %v1816_v30, %v1629_v31  ;;  %v1818_v42 = vld [vmem:[%s1966_s22 + $0x174] sm:$0xf]  ;;  %v1637_v43 = vld [vmem:[%s1966_s22 + $0x178] sm:$0xf0]  ;;  %v1512_v46 = vor.u32 %v1786_v40, %v1509_v41  ;;  %v1788_v52 = vld [vmem:[%s1966_s22 + $0x84] sm:$0xf] }
  0x22   : > { %v1640_v47 = vor.u32 %v1818_v42, %v1637_v43  ;;  %v1517_v53 = vld [vmem:[%s1966_s22 + $0x88] sm:$0xf0]  ;;  %v1820_v54 = vld [vmem:[%s1966_s22 + $0x184] sm:$0xf]  ;;  %v2052_v59 = vld [vmem:[%s2392_s2] ss:$0 sm:$0xff] }
  0x23   : > { %v1645_v55 = vld [vmem:[%s1966_s22 + $0x188] sm:$0xf0]  ;;  %v2057_v0 = vld [vmem:[%s2393_s3] ss:$0 sm:$0xff]  ;;  %v1790_v18 = vld [vmem:[%s1966_s22 + $0x94] sm:$0xf] }
  0x24   : > { %722 = vmatpush.bf16.msra.mxu0 %v1837_v12  ;;  %1858 = vmatpush.bf16.msra.mxu2 %v1837_v12  ;;  %v1491_v12 = vld [vmem:[%s1966_s22 + $0x50] sm:$0xf]  ;;  %v1525_v19 = vld [vmem:[%s1966_s22 + $0x98] sm:$0xf0] }
  0x25   : > { %891 = vmatpush.bf16.msra.mxu1 %v1845_v13  ;;  %1866 = vmatpush.bf16.msra.mxu3 %v1845_v13  ;;  %v1783_v13 = vld [vmem:[%s1966_s22 + $0x54] sm:$0xf0]  ;;  %v1528_v28 = vor.u32 %v1790_v18, %v1525_v19 }
  0x26   : > { %v1492_v20 = vor.u32 %v1783_v13, %v1491_v12  ;;  %v1523_v12 = vld [vmem:[%s1966_s22 + $0x90] sm:$0xf]  ;;  %v1791_v13 = vld [vmem:[%s1966_s22 + $0x94] sm:$0xf0] }
  0x28   : > { %723 = vmatpush.bf16.msra.mxu0 %v1836_v14  ;;  %1859 = vmatpush.bf16.msra.mxu2 %v1836_v14  ;;  %v1619_v14 = vld [vmem:[%s1966_s22 + $0x150] sm:$0xf] }
  0x29   : > { %892 = vmatpush.bf16.msra.mxu1 %v1844_v15  ;;  %1867 = vmatpush.bf16.msra.mxu3 %v1844_v15  ;;  %v1815_v15 = vld [vmem:[%s1966_s22 + $0x154] sm:$0xf0] }
  0x2a   : > { %v1620_v21 = vor.u32 %v1815_v15, %v1619_v14  ;;  %v1651_v14 = vld [vmem:[%s1966_s22 + $0x190] sm:$0xf]  ;;  %v1823_v15 = vld [vmem:[%s1966_s22 + $0x194] sm:$0xf0] }
  0x2b   : > { %724 = vmatmul.bf16.vlgmr.msra.gmra.mxu0 %v1452_v24  ;;  %804 = vmatmul.bf16.vlgmr.msra.gmra.mxu2 %v1580_v25  ;;  %v1499_v24 = vld [vmem:[%s1966_s22 + $0x60] sm:$0xf]  ;;  %v1785_v25 = vld [vmem:[%s1966_s22 + $0x64] sm:$0xf0] }
  0x2c   : > { %893 = vmatmul.bf16.vlgmr.msra.gmra.mxu1 %v1456_v26  ;;  %973 = vmatmul.bf16.vlgmr.msra.gmra.mxu3 %v1584_v27  ;;  %v1627_v26 = vld [vmem:[%s1966_s22 + $0x160] sm:$0xf]  ;;  %v1817_v27 = vld [vmem:[%s1966_s22 + $0x164] sm:$0xf0]  ;;  %v1500_v32 = vor.u32 %v1785_v25, %v1499_v24 }
  0x2d   : > { %v1628_v33 = vor.u32 %v1817_v27, %v1627_v26  ;;  %v1524_v26 = vor.u32 %v1791_v13, %v1523_v12  ;;  %v1652_v27 = vor.u32 %v1823_v15, %v1651_v14 }
  0x3b   : > { %729 = vmatmul.bf16.gmra.mxu0 %v1460_v36  ;;  %809 = vmatmul.bf16.gmra.mxu2 %v1588_v37  ;;  %v1507_v36 = vld [vmem:[%s1966_s22 + $0x70] sm:$0xf]  ;;  %v1787_v37 = vld [vmem:[%s1966_s22 + $0x74] sm:$0xf0] }
  0x3c   : > { %898 = vmatmul.bf16.gmra.mxu1 %v1464_v38  ;;  %978 = vmatmul.bf16.gmra.mxu3 %v1592_v39  ;;  %v1635_v38 = vld [vmem:[%s1966_s22 + $0x170] sm:$0xf]  ;;  %v1819_v39 = vld [vmem:[%s1966_s22 + $0x174] sm:$0xf0]  ;;  %v1508_v44 = vor.u32 %v1787_v37, %v1507_v36 }
  0x3d   : > { %v1636_v45 = vor.u32 %v1819_v39, %v1635_v38 }
  0x4b   : > { %734 = vmatmul.bf16.gmra.mxu0 %v1468_v48  ;;  %814 = vmatmul.bf16.gmra.mxu2 %v1596_v49  ;;  %v1515_v48 = vld [vmem:[%s1966_s22 + $0x80] sm:$0xf]  ;;  %v1789_v49 = vld [vmem:[%s1966_s22 + $0x84] sm:$0xf0] }
  0x4c   : > { %903 = vmatmul.bf16.gmra.mxu1 %v1472_v50  ;;  %983 = vmatmul.bf16.gmra.mxu3 %v1600_v51  ;;  %v1643_v50 = vld [vmem:[%s1966_s22 + $0x180] sm:$0xf]  ;;  %v1821_v51 = vld [vmem:[%s1966_s22 + $0x184] sm:$0xf0]  ;;  %v1516_v56 = vor.u32 %v1789_v49, %v1515_v48 }
  0x4d   : > { %v1644_v57 = vor.u32 %v1821_v51, %v1643_v50 }
  0x5b   : > { %739 = vmatmul.bf16.gmra.mxu0 %v1476_v60  ;;  %819 = vmatmul.bf16.gmra.mxu2 %v1604_v61  ;;  %v1520_v60 = vor.u32 %v1788_v52, %v1517_v53  ;;  %v1648_v61 = vor.u32 %v1820_v54, %v1645_v55  ;;  %v1531_v52 = vld [vmem:[%s1966_s22 + $0xa0] sm:$0xf]  ;;  %v1793_v53 = vld [vmem:[%s1966_s22 + $0xa4] sm:$0xf0] }
  0x5c   : > { %908 = vmatmul.bf16.gmra.mxu1 %v1480_v62  ;;  %988 = vmatmul.bf16.gmra.mxu3 %v1608_v63  ;;  %v1659_v54 = vld [vmem:[%s1966_s22 + $0x1a0] sm:$0xf]  ;;  %v1825_v55 = vld [vmem:[%s1966_s22 + $0x1a4] sm:$0xf0] }
  0x6b   : > { %744 = vmatmul.bf16.gmra.mxu0 %v1484_v8  ;;  %824 = vmatmul.bf16.gmra.mxu2 %v1612_v9 }
  0x6c   : > { %913 = vmatmul.bf16.gmra.mxu1 %v1488_v10  ;;  %993 = vmatmul.bf16.gmra.mxu3 %v1616_v11 }
  0x7b   : > { %749 = vmatmul.bf16.gmra.mxu0 %v1492_v20  ;;  %829 = vmatmul.bf16.gmra.mxu2 %v1620_v21  ;;  %v1822_v20 = vld [vmem:[%s1966_s22 + $0x194] sm:$0xf]  ;;  %v1653_v21 = vld [vmem:[%s1966_s22 + $0x198] sm:$0xf0] }
  0x7c   : > { %918 = vmatmul.bf16.gmra.mxu1 %v1496_v22  ;;  %998 = vmatmul.bf16.gmra.mxu3 %v1624_v23 }
  0x8b   : > { %754 = vmatmul.bf16.gmra.mxu0 %v1500_v32  ;;  %834 = vmatmul.bf16.gmra.mxu2 %v1628_v33  ;;  %v1656_v33 = vor.u32 %v1822_v20, %v1653_v21 }
  0x8c   : > { %923 = vmatmul.bf16.gmra.mxu1 %v1504_v34  ;;  %1003 = vmatmul.bf16.gmra.mxu3 %v1632_v35 }
  0x9b   : > { %759 = vmatmul.bf16.gmra.mxu0 %v1508_v44  ;;  %839 = vmatmul.bf16.gmra.mxu2 %v1636_v45 }
  0x9c   : > { %928 = vmatmul.bf16.gmra.mxu1 %v1512_v46  ;;  %1008 = vmatmul.bf16.gmra.mxu3 %v1640_v47 }
  0xa8   : > { %v725_v58 = vpop.f32.mrf.mxu0 }
  0xa9   : > { %v894_v62 = vpop.f32.mrf.mxu1 }
  0xaa   : > { %v895_v63 = vadd.f32 %v894_v62, %v725_v58  ;;  %v1792_v58 = vld [vmem:[%s1966_s22 + $0xa4] sm:$0xf]  ;;  %v1661_v62 = vld [vmem:[%s1966_s22 + $0x1a8] sm:$0xf0] }
  0xab   : > { %764 = vmatmul.bf16.gmra.mxu0 %v1516_v56  ;;  %844 = vmatmul.bf16.gmra.mxu2 %v1644_v57 }
  0xac   : > { %v1058_v1 = vmul.f32 %v2052_v59, %v895_v63  ;;  %933 = vmatmul.bf16.gmra.mxu1 %v1520_v60  ;;  %1013 = vmatmul.bf16.gmra.mxu3 %v1648_v61  ;;  %v1533_v60 = vld [vmem:[%s1966_s22 + $0xa8] sm:$0xf0]  ;;  %v1824_v61 = vld [vmem:[%s1966_s22 + $0x1a4] sm:$0xf] }
  0xae   : > { %v1126_v2 = vadd.f32 %v2057_v0, %v1058_v1  ;;  %v805_v3 = vpop.f32.mrf.mxu2 }
  0xaf   : > { %v974_v4 = vpop.f32.mrf.mxu3 }
  0xb0   : > { %v1190_v5 = vmax.f32 %v1126_v2, 0.0  ;;  %v975_v6 = vadd.f32 %v974_v4, %v805_v3  ;;  %v727_v7 = vpop.f32.mrf.mxu0  ;;  %v1532_v4 = vor.u32 %v1793_v53, %v1531_v52 }
  0xb1   : > { %v896_v8 = vpop.f32.mrf.mxu1 }
  0xb2   : > { %v1254_v9 = vpack.c.bf16 %v1190_v5, %v1190_v5  ;;  %v1090_v10 = vmul.f32 %v2052_v59, %v975_v6  ;;  %v897_v11 = vadd.f32 %v896_v8, %v727_v7  ;;  %v1660_v5 = vor.u32 %v1825_v55, %v1659_v54 }
  0xb3   : > { %v1536_v6 = vor.u32 %v1792_v58, %v1533_v60 }
  0xb4   : > { %1319 = vst.msk [vmem:[%s2065_s11] sm:$0xf] %vm1318_vm0, %v1254_v9  ;;  %v1158_v16 = vadd.f32 %v2057_v0, %v1090_v10  ;;  %v1059_v17 = vmul.f32 %v2052_v59, %v897_v11  ;;  %v1664_v11 = vor.u32 %v1824_v61, %v1661_v62 }
  0xb6   : > { %v1222_v22 = vmax.f32 %v1158_v16, 0.0  ;;  %v1127_v23 = vadd.f32 %v2057_v0, %v1059_v17  ;;  %v807_v24 = vpop.f32.mrf.mxu2 }
  0xb7   : > { %v976_v25 = vpop.f32.mrf.mxu3 }
  0xb8   : > { %v1286_v29 = vpack.c.bf16 %v1222_v22, %v1222_v22  ;;  %v1191_v30 = vmax.f32 %v1127_v23, 0.0  ;;  %v977_v31 = vadd.f32 %v976_v25, %v807_v24  ;;  %v730_v32 = vpop.f32.mrf.mxu0 }
  0xb9   : > { %v899_v34 = vpop.f32.mrf.mxu1 }
  0xba   : > { %1351 = vst.msk [vmem:[%s2065_s11 + $0x80] sm:$0xf] %vm1318_vm0, %v1286_v29  ;;  %v1255_v35 = vpack.c.bf16 %v1191_v30, %v1191_v30  ;;  %v1091_v36 = vmul.f32 %v2052_v59, %v977_v31  ;;  %v900_v37 = vadd.f32 %v899_v34, %v730_v32  ;;  %v1539_v30 = vld [vmem:[%s1966_s22 + $0xb0] sm:$0xf]  ;;  %v1795_v31 = vld [vmem:[%s1966_s22 + $0xb4] sm:$0xf0] }
  0xbb   : > { %769 = vmatmul.bf16.gmra.mxu0 %v1524_v26  ;;  %849 = vmatmul.bf16.gmra.mxu2 %v1652_v27  ;;  %v1667_v32 = vld [vmem:[%s1966_s22 + $0x1b0] sm:$0xf] }
  0xbc   : > { %1320 = vst.msk [vmem:[%s2065_s11 + $0x4] sm:$0xf] %vm1318_vm0, %v1255_v35  ;;  %v1159_v38 = vadd.f32 %v2057_v0, %v1091_v36  ;;  %v1060_v39 = vmul.f32 %v2052_v59, %v900_v37  ;;  %938 = vmatmul.bf16.gmra.mxu1 %v1528_v28  ;;  %1018 = vmatmul.bf16.gmra.mxu3 %v1656_v33  ;;  %v1827_v33 = vld [vmem:[%s1966_s22 + $0x1b4] sm:$0xf0]  ;;  %v1794_v36 = vld [vmem:[%s1966_s22 + $0xb4] sm:$0xf] }
  0xbd   : > { %v1541_v37 = vld [vmem:[%s1966_s22 + $0xb8] sm:$0xf0] }
  0xbe   : > { %v1223_v40 = vmax.f32 %v1159_v38, 0.0  ;;  %v1128_v41 = vadd.f32 %v2057_v0, %v1060_v39  ;;  %v810_v42 = vpop.f32.mrf.mxu2  ;;  %v1826_v38 = vld [vmem:[%s1966_s22 + $0x1b4] sm:$0xf]  ;;  %v1669_v39 = vld [vmem:[%s1966_s22 + $0x1b8] sm:$0xf0] }
  0xbf   : > { %v979_v43 = vpop.f32.mrf.mxu3 }
  0xc0   : > { %v1287_v44 = vpack.c.bf16 %v1223_v40, %v1223_v40  ;;  %v1192_v45 = vmax.f32 %v1128_v41, 0.0  ;;  %v980_v46 = vadd.f32 %v979_v43, %v810_v42  ;;  %v732_v47 = vpop.f32.mrf.mxu0 }
  0xc1   : > { %v901_v48 = vpop.f32.mrf.mxu1 }
  0xc2   : > { %1352 = vst.msk [vmem:[%s2065_s11 + $0x84] sm:$0xf] %vm1318_vm0, %v1287_v44  ;;  %v1256_v49 = vpack.c.bf16 %v1192_v45, %v1192_v45  ;;  %v1092_v50 = vmul.f32 %v2052_v59, %v980_v46  ;;  %v902_v51 = vadd.f32 %v901_v48, %v732_v47  ;;  %v1540_v44 = vor.u32 %v1795_v31, %v1539_v30 }
  0xc3   : > { %v1668_v45 = vor.u32 %v1827_v33, %v1667_v32  ;;  %v1544_v46 = vor.u32 %v1794_v36, %v1541_v37 }
  0xc4   : > { %1321 = vst.msk [vmem:[%s2065_s11 + $0x8] sm:$0xf] %vm1318_vm0, %v1256_v49  ;;  %v1160_v56 = vadd.f32 %v2057_v0, %v1092_v50  ;;  %v1061_v57 = vmul.f32 %v2052_v59, %v902_v51  ;;  %v1672_v51 = vor.u32 %v1826_v38, %v1669_v39 }
  0xc6   : > { %v1224_v63 = vmax.f32 %v1160_v56, 0.0  ;;  %v1129_v1 = vadd.f32 %v2057_v0, %v1061_v57  ;;  %v812_v2 = vpop.f32.mrf.mxu2 }
  0xc7   : > { %v981_v3 = vpop.f32.mrf.mxu3 }
  0xc8   : > { %v1288_v7 = vpack.c.bf16 %v1224_v63, %v1224_v63  ;;  %v1193_v8 = vmax.f32 %v1129_v1, 0.0  ;;  %v982_v9 = vadd.f32 %v981_v3, %v812_v2  ;;  %v735_v10 = vpop.f32.mrf.mxu0 }
  0xc9   : > { %v904_v12 = vpop.f32.mrf.mxu1 }
  0xca   : > { %1353 = vst.msk [vmem:[%s2065_s11 + $0x88] sm:$0xf] %vm1318_vm0, %v1288_v7  ;;  %v1257_v13 = vpack.c.bf16 %v1193_v8, %v1193_v8  ;;  %v1093_v14 = vmul.f32 %v2052_v59, %v982_v9  ;;  %v905_v15 = vadd.f32 %v904_v12, %v735_v10  ;;  %v1547_v8 = vld [vmem:[%s1966_s22 + $0xc0] sm:$0xf]  ;;  %v1797_v9 = vld [vmem:[%s1966_s22 + $0xc4] sm:$0xf0] }
  0xcb   : > { %774 = vmatmul.bf16.gmra.mxu0 %v1532_v4  ;;  %854 = vmatmul.bf16.gmra.mxu2 %v1660_v5  ;;  %v1675_v10 = vld [vmem:[%s1966_s22 + $0x1c0] sm:$0xf] }
  0xcc   : > { %1322 = vst.msk [vmem:[%s2065_s11 + $0xc] sm:$0xf] %vm1318_vm0, %v1257_v13  ;;  %v1161_v16 = vadd.f32 %v2057_v0, %v1093_v14  ;;  %v1062_v17 = vmul.f32 %v2052_v59, %v905_v15  ;;  %943 = vmatmul.bf16.gmra.mxu1 %v1536_v6  ;;  %1023 = vmatmul.bf16.gmra.mxu3 %v1664_v11  ;;  %v1829_v11 = vld [vmem:[%s1966_s22 + $0x1c4] sm:$0xf0]  ;;  %v1796_v14 = vld [vmem:[%s1966_s22 + $0xc4] sm:$0xf] }
  0xcd   : > { %v1549_v15 = vld [vmem:[%s1966_s22 + $0xc8] sm:$0xf0] }
  0xce   : > { %v1225_v18 = vmax.f32 %v1161_v16, 0.0  ;;  %v1130_v19 = vadd.f32 %v2057_v0, %v1062_v17  ;;  %v815_v20 = vpop.f32.mrf.mxu2  ;;  %v1828_v16 = vld [vmem:[%s1966_s22 + $0x1c4] sm:$0xf]  ;;  %v1677_v17 = vld [vmem:[%s1966_s22 + $0x1c8] sm:$0xf0] }
  0xcf   : > { %v984_v21 = vpop.f32.mrf.mxu3 }
  0xd0   : > { %v1289_v22 = vpack.c.bf16 %v1225_v18, %v1225_v18  ;;  %v1194_v23 = vmax.f32 %v1130_v19, 0.0  ;;  %v985_v24 = vadd.f32 %v984_v21, %v815_v20  ;;  %v737_v25 = vpop.f32.mrf.mxu0 }
  0xd1   : > { %v906_v26 = vpop.f32.mrf.mxu1 }
  0xd2   : > { %1354 = vst.msk [vmem:[%s2065_s11 + $0x8c] sm:$0xf] %vm1318_vm0, %v1289_v22  ;;  %v1258_v27 = vpack.c.bf16 %v1194_v23, %v1194_v23  ;;  %v1094_v28 = vmul.f32 %v2052_v59, %v985_v24  ;;  %v907_v29 = vadd.f32 %v906_v26, %v737_v25  ;;  %v1548_v22 = vor.u32 %v1797_v9, %v1547_v8 }
  0xd3   : > { %v1676_v23 = vor.u32 %v1829_v11, %v1675_v10  ;;  %v1552_v24 = vor.u32 %v1796_v14, %v1549_v15 }
  0xd4   : > { %1323 = vst.msk [vmem:[%s2065_s11 + $0x10] sm:$0xf] %vm1318_vm0, %v1258_v27  ;;  %v1162_v34 = vadd.f32 %v2057_v0, %v1094_v28  ;;  %v1063_v35 = vmul.f32 %v2052_v59, %v907_v29  ;;  %v1680_v29 = vor.u32 %v1828_v16, %v1677_v17 }
  0xd6   : > { %v1226_v40 = vmax.f32 %v1162_v34, 0.0  ;;  %v1131_v41 = vadd.f32 %v2057_v0, %v1063_v35  ;;  %v817_v42 = vpop.f32.mrf.mxu2 }
  0xd7   : > { %v986_v43 = vpop.f32.mrf.mxu3 }
  0xd8   : > { %v1290_v47 = vpack.c.bf16 %v1226_v40, %v1226_v40  ;;  %v1195_v48 = vmax.f32 %v1131_v41, 0.0  ;;  %v987_v49 = vadd.f32 %v986_v43, %v817_v42  ;;  %v740_v50 = vpop.f32.mrf.mxu0 }
  0xd9   : > { %v909_v52 = vpop.f32.mrf.mxu1 }
  0xda   : > { %1355 = vst.msk [vmem:[%s2065_s11 + $0x90] sm:$0xf] %vm1318_vm0, %v1290_v47  ;;  %v1259_v53 = vpack.c.bf16 %v1195_v48, %v1195_v48  ;;  %v1095_v54 = vmul.f32 %v2052_v59, %v987_v49  ;;  %v910_v55 = vadd.f32 %v909_v52, %v740_v50  ;;  %v1555_v48 = vld [vmem:[%s1966_s22 + $0xd0] sm:$0xf]  ;;  %v1799_v49 = vld [vmem:[%s1966_s22 + $0xd4] sm:$0xf0] }
  0xdb   : > { %779 = vmatmul.bf16.gmra.mxu0 %v1540_v44  ;;  %859 = vmatmul.bf16.gmra.mxu2 %v1668_v45  ;;  %v1683_v50 = vld [vmem:[%s1966_s22 + $0x1d0] sm:$0xf] }
  0xdc   : > { %1324 = vst.msk [vmem:[%s2065_s11 + $0x14] sm:$0xf] %vm1318_vm0, %v1259_v53  ;;  %v1163_v56 = vadd.f32 %v2057_v0, %v1095_v54  ;;  %v1064_v57 = vmul.f32 %v2052_v59, %v910_v55  ;;  %948 = vmatmul.bf16.gmra.mxu1 %v1544_v46  ;;  %1028 = vmatmul.bf16.gmra.mxu3 %v1672_v51  ;;  %v1831_v51 = vld [vmem:[%s1966_s22 + $0x1d4] sm:$0xf0]  ;;  %v1798_v54 = vld [vmem:[%s1966_s22 + $0xd4] sm:$0xf] }
  0xdd   : > { %v1557_v55 = vld [vmem:[%s1966_s22 + $0xd8] sm:$0xf0] }
  0xde   : > { %v1227_v58 = vmax.f32 %v1163_v56, 0.0  ;;  %v1132_v60 = vadd.f32 %v2057_v0, %v1064_v57  ;;  %v820_v61 = vpop.f32.mrf.mxu2  ;;  %v1830_v56 = vld [vmem:[%s1966_s22 + $0x1d4] sm:$0xf]  ;;  %v1685_v57 = vld [vmem:[%s1966_s22 + $0x1d8] sm:$0xf0] }
  0xdf   : > { %v989_v62 = vpop.f32.mrf.mxu3 }
  0xe0   : > { %v1291_v63 = vpack.c.bf16 %v1227_v58, %v1227_v58  ;;  %v1196_v1 = vmax.f32 %v1132_v60, 0.0  ;;  %v990_v2 = vadd.f32 %v989_v62, %v820_v61  ;;  %v742_v3 = vpop.f32.mrf.mxu0 }
  0xe1   : > { %v911_v4 = vpop.f32.mrf.mxu1 }
  0xe2   : > { %1356 = vst.msk [vmem:[%s2065_s11 + $0x94] sm:$0xf] %vm1318_vm0, %v1291_v63  ;;  %v1260_v5 = vpack.c.bf16 %v1196_v1, %v1196_v1  ;;  %v1096_v6 = vmul.f32 %v2052_v59, %v990_v2  ;;  %v912_v7 = vadd.f32 %v911_v4, %v742_v3  ;;  %v1556_v63 = vor.u32 %v1799_v49, %v1555_v48 }
  0xe3   : > { %v1684_v1 = vor.u32 %v1831_v51, %v1683_v50  ;;  %v1560_v2 = vor.u32 %v1798_v54, %v1557_v55 }
  0xe4   : > { %1325 = vst.msk [vmem:[%s2065_s11 + $0x18] sm:$0xf] %vm1318_vm0, %v1260_v5  ;;  %v1164_v12 = vadd.f32 %v2057_v0, %v1096_v6  ;;  %v1065_v13 = vmul.f32 %v2052_v59, %v912_v7  ;;  %v1688_v7 = vor.u32 %v1830_v56, %v1685_v57 }
  0xe6   : > { %v1228_v18 = vmax.f32 %v1164_v12, 0.0  ;;  %v1133_v19 = vadd.f32 %v2057_v0, %v1065_v13  ;;  %v822_v20 = vpop.f32.mrf.mxu2 }
  0xe7   : > { %v991_v21 = vpop.f32.mrf.mxu3 }
  0xe8   : > { %v1292_v25 = vpack.c.bf16 %v1228_v18, %v1228_v18  ;;  %v1197_v26 = vmax.f32 %v1133_v19, 0.0  ;;  %v992_v27 = vadd.f32 %v991_v21, %v822_v20  ;;  %v745_v28 = vpop.f32.mrf.mxu0 }
  0xe9   : > { %v914_v30 = vpop.f32.mrf.mxu1 }
  0xea   : > { %1357 = vst.msk [vmem:[%s2065_s11 + $0x98] sm:$0xf] %vm1318_vm0, %v1292_v25  ;;  %v1261_v31 = vpack.c.bf16 %v1197_v26, %v1197_v26  ;;  %v1097_v32 = vmul.f32 %v2052_v59, %v992_v27  ;;  %v915_v33 = vadd.f32 %v914_v30, %v745_v28  ;;  %v1563_v26 = vld [vmem:[%s1966_s22 + $0xe0] sm:$0xf]  ;;  %v1801_v27 = vld [vmem:[%s1966_s22 + $0xe4] sm:$0xf0] }
  0xeb   : > { %784 = vmatmul.bf16.gmra.mxu0 %v1548_v22  ;;  %864 = vmatmul.bf16.gmra.mxu2 %v1676_v23  ;;  %v1691_v28 = vld [vmem:[%s1966_s22 + $0x1e0] sm:$0xf] }
  0xec   : > { %1326 = vst.msk [vmem:[%s2065_s11 + $0x1c] sm:$0xf] %vm1318_vm0, %v1261_v31  ;;  %v1165_v34 = vadd.f32 %v2057_v0, %v1097_v32  ;;  %v1066_v35 = vmul.f32 %v2052_v59, %v915_v33  ;;  %953 = vmatmul.bf16.gmra.mxu1 %v1552_v24  ;;  %1033 = vmatmul.bf16.gmra.mxu3 %v1680_v29  ;;  %v1833_v29 = vld [vmem:[%s1966_s22 + $0x1e4] sm:$0xf0]  ;;  %v1800_v32 = vld [vmem:[%s1966_s22 + $0xe4] sm:$0xf] }
  0xed   : > { %v1565_v33 = vld [vmem:[%s1966_s22 + $0xe8] sm:$0xf0] }
  0xee   : > { %v1229_v36 = vmax.f32 %v1165_v34, 0.0  ;;  %v1134_v37 = vadd.f32 %v2057_v0, %v1066_v35  ;;  %v825_v38 = vpop.f32.mrf.mxu2  ;;  %v1832_v34 = vld [vmem:[%s1966_s22 + $0x1e4] sm:$0xf]  ;;  %v1693_v35 = vld [vmem:[%s1966_s22 + $0x1e8] sm:$0xf0] }
  0xef   : > { %v994_v39 = vpop.f32.mrf.mxu3 }
  0xf0   : > { %v1293_v40 = vpack.c.bf16 %v1229_v36, %v1229_v36  ;;  %v1198_v41 = vmax.f32 %v1134_v37, 0.0  ;;  %v995_v42 = vadd.f32 %v994_v39, %v825_v38  ;;  %v747_v43 = vpop.f32.mrf.mxu0 }
  0xf1   : > { %v916_v44 = vpop.f32.mrf.mxu1 }
  0xf2   : > { %1358 = vst.msk [vmem:[%s2065_s11 + $0x9c] sm:$0xf] %vm1318_vm0, %v1293_v40  ;;  %v1262_v45 = vpack.c.bf16 %v1198_v41, %v1198_v41  ;;  %v1098_v46 = vmul.f32 %v2052_v59, %v995_v42  ;;  %v917_v47 = vadd.f32 %v916_v44, %v747_v43  ;;  %v1564_v40 = vor.u32 %v1801_v27, %v1563_v26 }
  0xf3   : > { %v1692_v41 = vor.u32 %v1833_v29, %v1691_v28  ;;  %v1568_v42 = vor.u32 %v1800_v32, %v1565_v33 }
  0xf4   : > { %1327 = vst.msk [vmem:[%s2065_s11 + $0x20] sm:$0xf] %vm1318_vm0, %v1262_v45  ;;  %v1166_v52 = vadd.f32 %v2057_v0, %v1098_v46  ;;  %v1067_v53 = vmul.f32 %v2052_v59, %v917_v47  ;;  %v1696_v47 = vor.u32 %v1832_v34, %v1693_v35 }
  0xf6   : > { %v1230_v58 = vmax.f32 %v1166_v52, 0.0  ;;  %v1135_v60 = vadd.f32 %v2057_v0, %v1067_v53  ;;  %v827_v61 = vpop.f32.mrf.mxu2 }
  0xf7   : > { %v996_v62 = vpop.f32.mrf.mxu3 }
  0xf8   : > { %v1294_v3 = vpack.c.bf16 %v1230_v58, %v1230_v58  ;;  %v1199_v4 = vmax.f32 %v1135_v60, 0.0  ;;  %v997_v5 = vadd.f32 %v996_v62, %v827_v61  ;;  %v750_v6 = vpop.f32.mrf.mxu0 }
  0xf9   : > { %v919_v8 = vpop.f32.mrf.mxu1 }
  0xfa   : > { %1359 = vst.msk [vmem:[%s2065_s11 + $0xa0] sm:$0xf] %vm1318_vm0, %v1294_v3  ;;  %v1263_v9 = vpack.c.bf16 %v1199_v4, %v1199_v4  ;;  %v1099_v10 = vmul.f32 %v2052_v59, %v997_v5  ;;  %v920_v11 = vadd.f32 %v919_v8, %v750_v6  ;;  %v1571_v4 = vld [vmem:[%s1966_s22 + $0xf0] sm:$0xf]  ;;  %v1803_v5 = vld [vmem:[%s1966_s22 + $0xf4] sm:$0xf0] }
  0xfb   : > { %789 = vmatmul.bf16.gmra.mxu0 %v1556_v63  ;;  %869 = vmatmul.bf16.gmra.mxu2 %v1684_v1  ;;  %v1699_v6 = vld [vmem:[%s1966_s22 + $0x1f0] sm:$0xf] }
  0xfc   : > { %1328 = vst.msk [vmem:[%s2065_s11 + $0x24] sm:$0xf] %vm1318_vm0, %v1263_v9  ;;  %v1167_v12 = vadd.f32 %v2057_v0, %v1099_v10  ;;  %v1068_v13 = vmul.f32 %v2052_v59, %v920_v11  ;;  %958 = vmatmul.bf16.gmra.mxu1 %v1560_v2  ;;  %1038 = vmatmul.bf16.gmra.mxu3 %v1688_v7  ;;  %v1835_v7 = vld [vmem:[%s1966_s22 + $0x1f4] sm:$0xf0]  ;;  %v1802_v10 = vld [vmem:[%s1966_s22 + $0xf4] sm:$0xf] }
  0xfd   : > { %v1573_v11 = vld [vmem:[%s1966_s22 + $0xf8] sm:$0xf0] }
  0xfe   : > { %v1231_v14 = vmax.f32 %v1167_v12, 0.0  ;;  %v1136_v15 = vadd.f32 %v2057_v0, %v1068_v13  ;;  %v830_v16 = vpop.f32.mrf.mxu2  ;;  %v1834_v12 = vld [vmem:[%s1966_s22 + $0x1f4] sm:$0xf]  ;;  %v1701_v13 = vld [vmem:[%s1966_s22 + $0x1f8] sm:$0xf0] }
  0xff   : > { %v999_v17 = vpop.f32.mrf.mxu3 }
 0x100   : > { %v1295_v18 = vpack.c.bf16 %v1231_v14, %v1231_v14  ;;  %v1200_v19 = vmax.f32 %v1136_v15, 0.0  ;;  %v1000_v20 = vadd.f32 %v999_v17, %v830_v16  ;;  %v752_v21 = vpop.f32.mrf.mxu0 }
 0x101   : > { %v921_v22 = vpop.f32.mrf.mxu1 }
 0x102   : > { %1360 = vst.msk [vmem:[%s2065_s11 + $0xa4] sm:$0xf] %vm1318_vm0, %v1295_v18  ;;  %v1264_v23 = vpack.c.bf16 %v1200_v19, %v1200_v19  ;;  %v1100_v24 = vmul.f32 %v2052_v59, %v1000_v20  ;;  %v922_v25 = vadd.f32 %v921_v22, %v752_v21  ;;  %v1572_v18 = vor.u32 %v1803_v5, %v1571_v4 }
 0x103   : > { %v1700_v19 = vor.u32 %v1835_v7, %v1699_v6  ;;  %v1576_v20 = vor.u32 %v1802_v10, %v1573_v11 }
 0x104   : > { %1329 = vst.msk [vmem:[%s2065_s11 + $0x28] sm:$0xf] %vm1318_vm0, %v1264_v23  ;;  %v1168_v30 = vadd.f32 %v2057_v0, %v1100_v24  ;;  %v1069_v31 = vmul.f32 %v2052_v59, %v922_v25  ;;  %v1704_v25 = vor.u32 %v1834_v12, %v1701_v13 }
 0x106   : > { %v1232_v36 = vmax.f32 %v1168_v30, 0.0  ;;  %v1137_v37 = vadd.f32 %v2057_v0, %v1069_v31  ;;  %v832_v38 = vpop.f32.mrf.mxu2 }
 0x107   : > { %v1001_v39 = vpop.f32.mrf.mxu3 }
 0x108   : > { %v1296_v43 = vpack.c.bf16 %v1232_v36, %v1232_v36  ;;  %v1201_v44 = vmax.f32 %v1137_v37, 0.0  ;;  %v1002_v45 = vadd.f32 %v1001_v39, %v832_v38  ;;  %v755_v46 = vpop.f32.mrf.mxu0 }
 0x109   : > { %v924_v48 = vpop.f32.mrf.mxu1 }
 0x10a   : > { %1361 = vst.msk [vmem:[%s2065_s11 + $0xa8] sm:$0xf] %vm1318_vm0, %v1296_v43  ;;  %v1265_v49 = vpack.c.bf16 %v1201_v44, %v1201_v44  ;;  %v1101_v50 = vmul.f32 %v2052_v59, %v1002_v45  ;;  %v925_v51 = vadd.f32 %v924_v48, %v755_v46 }
 0x10b   : > { %794 = vmatmul.bf16.gmra.mxu0 %v1564_v40  ;;  %874 = vmatmul.bf16.gmra.mxu2 %v1692_v41 }
 0x10c   : > { %1330 = vst.msk [vmem:[%s2065_s11 + $0x2c] sm:$0xf] %vm1318_vm0, %v1265_v49  ;;  %v1169_v52 = vadd.f32 %v2057_v0, %v1101_v50  ;;  %v1070_v53 = vmul.f32 %v2052_v59, %v925_v51  ;;  %963 = vmatmul.bf16.gmra.mxu1 %v1568_v42  ;;  %1043 = vmatmul.bf16.gmra.mxu3 %v1696_v47 }
 0x10e   : > { %v1233_v54 = vmax.f32 %v1169_v52, 0.0  ;;  %v1138_v55 = vadd.f32 %v2057_v0, %v1070_v53  ;;  %v835_v56 = vpop.f32.mrf.mxu2 }
 0x10f   : > { %v1004_v57 = vpop.f32.mrf.mxu3 }
 0x110   : > { %v1297_v58 = vpack.c.bf16 %v1233_v54, %v1233_v54  ;;  %v1202_v60 = vmax.f32 %v1138_v55, 0.0  ;;  %v1005_v61 = vadd.f32 %v1004_v57, %v835_v56  ;;  %v757_v62 = vpop.f32.mrf.mxu0 }
 0x111   : > { %v926_v63 = vpop.f32.mrf.mxu1 }
 0x112   : > { %1362 = vst.msk [vmem:[%s2065_s11 + $0xac] sm:$0xf] %vm1318_vm0, %v1297_v58  ;;  %v1266_v1 = vpack.c.bf16 %v1202_v60, %v1202_v60  ;;  %v1102_v2 = vmul.f32 %v2052_v59, %v1005_v61  ;;  %v927_v3 = vadd.f32 %v926_v63, %v757_v62 }
 0x114   : > { %1331 = vst.msk [vmem:[%s2065_s11 + $0x30] sm:$0xf] %vm1318_vm0, %v1266_v1  ;;  %v1170_v8 = vadd.f32 %v2057_v0, %v1102_v2  ;;  %v1071_v9 = vmul.f32 %v2052_v59, %v927_v3 }
 0x116   : > { %v1234_v14 = vmax.f32 %v1170_v8, 0.0  ;;  %v1139_v15 = vadd.f32 %v2057_v0, %v1071_v9  ;;  %v837_v16 = vpop.f32.mrf.mxu2 }
 0x117   : > { %v1006_v17 = vpop.f32.mrf.mxu3 }
 0x118   : > { %v1298_v21 = vpack.c.bf16 %v1234_v14, %v1234_v14  ;;  %v1203_v22 = vmax.f32 %v1139_v15, 0.0  ;;  %v1007_v23 = vadd.f32 %v1006_v17, %v837_v16  ;;  %v760_v24 = vpop.f32.mrf.mxu0 }
 0x119   : > { %v929_v26 = vpop.f32.mrf.mxu1 }
 0x11a   : > { %1363 = vst.msk [vmem:[%s2065_s11 + $0xb0] sm:$0xf] %vm1318_vm0, %v1298_v21  ;;  %v1267_v27 = vpack.c.bf16 %v1203_v22, %v1203_v22  ;;  %v1103_v28 = vmul.f32 %v2052_v59, %v1007_v23  ;;  %v930_v29 = vadd.f32 %v929_v26, %v760_v24 }
 0x11b   : > { %799 = vmatmul.bf16.gmra.mxu0 %v1572_v18  ;;  %879 = vmatmul.bf16.gmra.mxu2 %v1700_v19 }
 0x11c   : > { %1332 = vst.msk [vmem:[%s2065_s11 + $0x34] sm:$0xf] %vm1318_vm0, %v1267_v27  ;;  %v1171_v30 = vadd.f32 %v2057_v0, %v1103_v28  ;;  %v1072_v31 = vmul.f32 %v2052_v59, %v930_v29  ;;  %968 = vmatmul.bf16.gmra.mxu1 %v1576_v20  ;;  %1048 = vmatmul.bf16.gmra.mxu3 %v1704_v25 }
 0x11e   : > { %v1235_v32 = vmax.f32 %v1171_v30, 0.0  ;;  %v1140_v33 = vadd.f32 %v2057_v0, %v1072_v31  ;;  %v840_v34 = vpop.f32.mrf.mxu2 }
 0x11f   : > { %v1009_v35 = vpop.f32.mrf.mxu3 }
 0x120   : > { %v1299_v36 = vpack.c.bf16 %v1235_v32, %v1235_v32  ;;  %v1204_v37 = vmax.f32 %v1140_v33, 0.0  ;;  %v1010_v38 = vadd.f32 %v1009_v35, %v840_v34  ;;  %v762_v39 = vpop.f32.mrf.mxu0 }
 0x121   : > { %v931_v40 = vpop.f32.mrf.mxu1 }
 0x122   : > { %1364 = vst.msk [vmem:[%s2065_s11 + $0xb4] sm:$0xf] %vm1318_vm0, %v1299_v36  ;;  %v1268_v41 = vpack.c.bf16 %v1204_v37, %v1204_v37  ;;  %v1104_v42 = vmul.f32 %v2052_v59, %v1010_v38  ;;  %v932_v43 = vadd.f32 %v931_v40, %v762_v39 }
 0x124   : > { %1333 = vst.msk [vmem:[%s2065_s11 + $0x38] sm:$0xf] %vm1318_vm0, %v1268_v41  ;;  %v1172_v44 = vadd.f32 %v2057_v0, %v1104_v42  ;;  %v1073_v45 = vmul.f32 %v2052_v59, %v932_v43 }
 0x126   : > { %v1236_v46 = vmax.f32 %v1172_v44, 0.0  ;;  %v1141_v47 = vadd.f32 %v2057_v0, %v1073_v45  ;;  %v842_v48 = vpop.f32.mrf.mxu2 }
 0x127   : > { %v1011_v49 = vpop.f32.mrf.mxu3 }
 0x128   : > { %v1300_v50 = vpack.c.bf16 %v1236_v46, %v1236_v46  ;;  %v1205_v51 = vmax.f32 %v1141_v47, 0.0  ;;  %v1012_v52 = vadd.f32 %v1011_v49, %v842_v48  ;;  %v765_v53 = vpop.f32.mrf.mxu0 }
 0x129   : > { %v934_v54 = vpop.f32.mrf.mxu1 }
 0x12a   : > { %1365 = vst.msk [vmem:[%s2065_s11 + $0xb8] sm:$0xf] %vm1318_vm0, %v1300_v50  ;;  %v1269_v55 = vpack.c.bf16 %v1205_v51, %v1205_v51  ;;  %v1105_v56 = vmul.f32 %v2052_v59, %v1012_v52  ;;  %v935_v57 = vadd.f32 %v934_v54, %v765_v53 }
 0x12c   : > { %1334 = vst.msk [vmem:[%s2065_s11 + $0x3c] sm:$0xf] %vm1318_vm0, %v1269_v55  ;;  %v1173_v58 = vadd.f32 %v2057_v0, %v1105_v56  ;;  %v1074_v60 = vmul.f32 %v2052_v59, %v935_v57 }
 0x12e   : > { %v1237_v61 = vmax.f32 %v1173_v58, 0.0  ;;  %v1142_v62 = vadd.f32 %v2057_v0, %v1074_v60  ;;  %v845_v63 = vpop.f32.mrf.mxu2 }
 0x12f   : > { %v1014_v1 = vpop.f32.mrf.mxu3 }
 0x130   : > { %v1301_v2 = vpack.c.bf16 %v1237_v61, %v1237_v61  ;;  %v1206_v3 = vmax.f32 %v1142_v62, 0.0  ;;  %v1015_v4 = vadd.f32 %v1014_v1, %v845_v63  ;;  %v767_v5 = vpop.f32.mrf.mxu0 }
 0x131   : > { %v936_v6 = vpop.f32.mrf.mxu1 }
 0x132   : > { %1366 = vst.msk [vmem:[%s2065_s11 + $0xbc] sm:$0xf] %vm1318_vm0, %v1301_v2  ;;  %v1270_v7 = vpack.c.bf16 %v1206_v3, %v1206_v3  ;;  %v1106_v8 = vmul.f32 %v2052_v59, %v1015_v4  ;;  %v937_v9 = vadd.f32 %v936_v6, %v767_v5 }
 0x134   : > { %1335 = vst.msk [vmem:[%s2065_s11 + $0x40] sm:$0xf] %vm1318_vm0, %v1270_v7  ;;  %v1174_v10 = vadd.f32 %v2057_v0, %v1106_v8  ;;  %v1075_v11 = vmul.f32 %v2052_v59, %v937_v9 }
 0x136   : > { %v1238_v12 = vmax.f32 %v1174_v10, 0.0  ;;  %v1143_v13 = vadd.f32 %v2057_v0, %v1075_v11  ;;  %v847_v14 = vpop.f32.mrf.mxu2 }
 0x137   : > { %v1016_v15 = vpop.f32.mrf.mxu3 }
 0x138   : > { %v1302_v16 = vpack.c.bf16 %v1238_v12, %v1238_v12  ;;  %v1207_v17 = vmax.f32 %v1143_v13, 0.0  ;;  %v1017_v18 = vadd.f32 %v1016_v15, %v847_v14  ;;  %v770_v19 = vpop.f32.mrf.mxu0 }
 0x139   : > { %v939_v20 = vpop.f32.mrf.mxu1 }
 0x13a   : > { %1367 = vst.msk [vmem:[%s2065_s11 + $0xc0] sm:$0xf] %vm1318_vm0, %v1302_v16  ;;  %v1271_v21 = vpack.c.bf16 %v1207_v17, %v1207_v17  ;;  %v1107_v22 = vmul.f32 %v2052_v59, %v1017_v18  ;;  %v940_v23 = vadd.f32 %v939_v20, %v770_v19 }
 0x13c   : > { %1336 = vst.msk [vmem:[%s2065_s11 + $0x44] sm:$0xf] %vm1318_vm0, %v1271_v21  ;;  %v1175_v24 = vadd.f32 %v2057_v0, %v1107_v22  ;;  %v1076_v25 = vmul.f32 %v2052_v59, %v940_v23 }
 0x13e   : > { %v1239_v26 = vmax.f32 %v1175_v24, 0.0  ;;  %v1144_v27 = vadd.f32 %v2057_v0, %v1076_v25  ;;  %v850_v28 = vpop.f32.mrf.mxu2 }
 0x13f   : > { %v1019_v29 = vpop.f32.mrf.mxu3 }
 0x140   : > { %v1303_v30 = vpack.c.bf16 %v1239_v26, %v1239_v26  ;;  %v1208_v31 = vmax.f32 %v1144_v27, 0.0  ;;  %v1020_v32 = vadd.f32 %v1019_v29, %v850_v28  ;;  %v772_v33 = vpop.f32.mrf.mxu0 }
 0x141   : > { %v941_v34 = vpop.f32.mrf.mxu1 }
 0x142   : > { %1368 = vst.msk [vmem:[%s2065_s11 + $0xc4] sm:$0xf] %vm1318_vm0, %v1303_v30  ;;  %v1272_v35 = vpack.c.bf16 %v1208_v31, %v1208_v31  ;;  %v1108_v36 = vmul.f32 %v2052_v59, %v1020_v32  ;;  %v942_v37 = vadd.f32 %v941_v34, %v772_v33 }
 0x144   : > { %1337 = vst.msk [vmem:[%s2065_s11 + $0x48] sm:$0xf] %vm1318_vm0, %v1272_v35  ;;  %v1176_v38 = vadd.f32 %v2057_v0, %v1108_v36  ;;  %v1077_v39 = vmul.f32 %v2052_v59, %v942_v37 }
 0x146   : > { %v1240_v40 = vmax.f32 %v1176_v38, 0.0  ;;  %v1145_v41 = vadd.f32 %v2057_v0, %v1077_v39  ;;  %v852_v42 = vpop.f32.mrf.mxu2 }
 0x147   : > { %v1021_v43 = vpop.f32.mrf.mxu3 }
 0x148   : > { %v1304_v44 = vpack.c.bf16 %v1240_v40, %v1240_v40  ;;  %v1209_v45 = vmax.f32 %v1145_v41, 0.0  ;;  %v1022_v46 = vadd.f32 %v1021_v43, %v852_v42  ;;  %v775_v47 = vpop.f32.mrf.mxu0 }
 0x149   : > { %v944_v48 = vpop.f32.mrf.mxu1 }
 0x14a   : > { %1369 = vst.msk [vmem:[%s2065_s11 + $0xc8] sm:$0xf] %vm1318_vm0, %v1304_v44  ;;  %v1273_v49 = vpack.c.bf16 %v1209_v45, %v1209_v45  ;;  %v1109_v50 = vmul.f32 %v2052_v59, %v1022_v46  ;;  %v945_v51 = vadd.f32 %v944_v48, %v775_v47 }
 0x14c   : > { %1338 = vst.msk [vmem:[%s2065_s11 + $0x4c] sm:$0xf] %vm1318_vm0, %v1273_v49  ;;  %v1177_v52 = vadd.f32 %v2057_v0, %v1109_v50  ;;  %v1078_v53 = vmul.f32 %v2052_v59, %v945_v51 }
 0x14e   : > { %v1241_v54 = vmax.f32 %v1177_v52, 0.0  ;;  %v1146_v55 = vadd.f32 %v2057_v0, %v1078_v53  ;;  %v855_v56 = vpop.f32.mrf.mxu2 }
 0x14f   : > { %v1024_v57 = vpop.f32.mrf.mxu3 }
 0x150   : > { %v1305_v58 = vpack.c.bf16 %v1241_v54, %v1241_v54  ;;  %v1210_v60 = vmax.f32 %v1146_v55, 0.0  ;;  %v1025_v61 = vadd.f32 %v1024_v57, %v855_v56  ;;  %v777_v62 = vpop.f32.mrf.mxu0 }
 0x151   : > { %v946_v63 = vpop.f32.mrf.mxu1 }
 0x152   : > { %1370 = vst.msk [vmem:[%s2065_s11 + $0xcc] sm:$0xf] %vm1318_vm0, %v1305_v58  ;;  %v1274_v1 = vpack.c.bf16 %v1210_v60, %v1210_v60  ;;  %v1110_v2 = vmul.f32 %v2052_v59, %v1025_v61  ;;  %v947_v3 = vadd.f32 %v946_v63, %v777_v62  ;;  %v2318_v58 = vld [vmem:[%s2392_s2] ss:$0 sm:$0xff] }
 0x154   : > { %1339 = vst.msk [vmem:[%s2065_s11 + $0x50] sm:$0xf] %vm1318_vm0, %v1274_v1  ;;  %v1178_v4 = vadd.f32 %v2057_v0, %v1110_v2  ;;  %v1079_v5 = vmul.f32 %v2052_v59, %v947_v3 }
 0x156   : > { %v1242_v6 = vmax.f32 %v1178_v4, 0.0  ;;  %v1147_v7 = vadd.f32 %v2057_v0, %v1079_v5  ;;  %v857_v8 = vpop.f32.mrf.mxu2 }
 0x157   : > { %v1026_v9 = vpop.f32.mrf.mxu3 }
 0x158   : > { %v1306_v10 = vpack.c.bf16 %v1242_v6, %v1242_v6  ;;  %v1211_v11 = vmax.f32 %v1147_v7, 0.0  ;;  %v1027_v12 = vadd.f32 %v1026_v9, %v857_v8  ;;  %v780_v13 = vpop.f32.mrf.mxu0 }
 0x159   : > { %v949_v14 = vpop.f32.mrf.mxu1 }
 0x15a   : > { %1371 = vst.msk [vmem:[%s2065_s11 + $0xd0] sm:$0xf] %vm1318_vm0, %v1306_v10  ;;  %v1275_v15 = vpack.c.bf16 %v1211_v11, %v1211_v11  ;;  %v1111_v16 = vmul.f32 %v2052_v59, %v1027_v12  ;;  %v950_v17 = vadd.f32 %v949_v14, %v780_v13 }
 0x15c   : > { %1340 = vst.msk [vmem:[%s2065_s11 + $0x54] sm:$0xf] %vm1318_vm0, %v1275_v15  ;;  %v1179_v18 = vadd.f32 %v2057_v0, %v1111_v16  ;;  %v1080_v19 = vmul.f32 %v2052_v59, %v950_v17 }
 0x15e   : > { %v1243_v20 = vmax.f32 %v1179_v18, 0.0  ;;  %v1148_v21 = vadd.f32 %v2057_v0, %v1080_v19  ;;  %v860_v22 = vpop.f32.mrf.mxu2 }
 0x15f   : > { %v1029_v23 = vpop.f32.mrf.mxu3 }
 0x160   : > { %v1307_v24 = vpack.c.bf16 %v1243_v20, %v1243_v20  ;;  %v1212_v25 = vmax.f32 %v1148_v21, 0.0  ;;  %v1030_v26 = vadd.f32 %v1029_v23, %v860_v22  ;;  %v782_v27 = vpop.f32.mrf.mxu0 }
 0x161   : > { %v951_v28 = vpop.f32.mrf.mxu1 }
 0x162   : > { %1372 = vst.msk [vmem:[%s2065_s11 + $0xd4] sm:$0xf] %vm1318_vm0, %v1307_v24  ;;  %v1276_v29 = vpack.c.bf16 %v1212_v25, %v1212_v25  ;;  %v1112_v30 = vmul.f32 %v2052_v59, %v1030_v26  ;;  %v952_v31 = vadd.f32 %v951_v28, %v782_v27 }
 0x164   : > { %1341 = vst.msk [vmem:[%s2065_s11 + $0x58] sm:$0xf] %vm1318_vm0, %v1276_v29  ;;  %v1180_v32 = vadd.f32 %v2057_v0, %v1112_v30  ;;  %v1081_v33 = vmul.f32 %v2052_v59, %v952_v31 }
 0x166   : > { %v1244_v34 = vmax.f32 %v1180_v32, 0.0  ;;  %v1149_v35 = vadd.f32 %v2057_v0, %v1081_v33  ;;  %v862_v36 = vpop.f32.mrf.mxu2 }
 0x167   : > { %v1031_v37 = vpop.f32.mrf.mxu3 }
 0x168   : > { %v1308_v38 = vpack.c.bf16 %v1244_v34, %v1244_v34  ;;  %v1213_v39 = vmax.f32 %v1149_v35, 0.0  ;;  %v1032_v40 = vadd.f32 %v1031_v37, %v862_v36  ;;  %v785_v41 = vpop.f32.mrf.mxu0 }
 0x169   : > { %v954_v42 = vpop.f32.mrf.mxu1 }
 0x16a   : > { %1373 = vst.msk [vmem:[%s2065_s11 + $0xd8] sm:$0xf] %vm1318_vm0, %v1308_v38  ;;  %v1277_v43 = vpack.c.bf16 %v1213_v39, %v1213_v39  ;;  %v1113_v44 = vmul.f32 %v2052_v59, %v1032_v40  ;;  %v955_v45 = vadd.f32 %v954_v42, %v785_v41 }
 0x16c   : > { %1342 = vst.msk [vmem:[%s2065_s11 + $0x5c] sm:$0xf] %vm1318_vm0, %v1277_v43  ;;  %v1181_v46 = vadd.f32 %v2057_v0, %v1113_v44  ;;  %v1082_v47 = vmul.f32 %v2052_v59, %v955_v45 }
 0x16e   : > { %v1245_v48 = vmax.f32 %v1181_v46, 0.0  ;;  %v1150_v49 = vadd.f32 %v2057_v0, %v1082_v47  ;;  %v865_v50 = vpop.f32.mrf.mxu2  ;;  %v2326_v0 = vld [vmem:[%s2393_s3] ss:$0 sm:$0xff] }
 0x16f   : > { %v1034_v51 = vpop.f32.mrf.mxu3 }
 0x170   : > { %v1309_v52 = vpack.c.bf16 %v1245_v48, %v1245_v48  ;;  %v1214_v53 = vmax.f32 %v1150_v49, 0.0  ;;  %v1035_v54 = vadd.f32 %v1034_v51, %v865_v50  ;;  %v787_v55 = vpop.f32.mrf.mxu0 }
 0x171   : > { %v956_v56 = vpop.f32.mrf.mxu1 }
 0x172   : > { %1374 = vst.msk [vmem:[%s2065_s11 + $0xdc] sm:$0xf] %vm1318_vm0, %v1309_v52  ;;  %v1278_v57 = vpack.c.bf16 %v1214_v53, %v1214_v53  ;;  %v1114_v59 = vmul.f32 %v2318_v58, %v1035_v54  ;;  %v957_v60 = vadd.f32 %v956_v56, %v787_v55 }
 0x174   : > { %1343 = vst.msk [vmem:[%s2065_s11 + $0x60] sm:$0xf] %vm1318_vm0, %v1278_v57  ;;  %v1182_v61 = vadd.f32 %v2326_v0, %v1114_v59  ;;  %v1083_v62 = vmul.f32 %v2318_v58, %v957_v60 }
 0x176   : > { %v1246_v63 = vmax.f32 %v1182_v61, 0.0  ;;  %v1151_v1 = vadd.f32 %v2326_v0, %v1083_v62  ;;  %v867_v2 = vpop.f32.mrf.mxu2 }
 0x177   : > { %v1036_v3 = vpop.f32.mrf.mxu3 }
 0x178   : > { %v1310_v4 = vpack.c.bf16 %v1246_v63, %v1246_v63  ;;  %v1215_v5 = vmax.f32 %v1151_v1, 0.0  ;;  %v1037_v6 = vadd.f32 %v1036_v3, %v867_v2  ;;  %v790_v7 = vpop.f32.mrf.mxu0 }
 0x179   : > { %v959_v8 = vpop.f32.mrf.mxu1 }
 0x17a   : > { %1375 = vst.msk [vmem:[%s2065_s11 + $0xe0] sm:$0xf] %vm1318_vm0, %v1310_v4  ;;  %v1279_v9 = vpack.c.bf16 %v1215_v5, %v1215_v5  ;;  %v1115_v10 = vmul.f32 %v2318_v58, %v1037_v6  ;;  %v960_v11 = vadd.f32 %v959_v8, %v790_v7 }
 0x17c   : > { %1344 = vst.msk [vmem:[%s2065_s11 + $0x64] sm:$0xf] %vm1318_vm0, %v1279_v9  ;;  %v1183_v12 = vadd.f32 %v2326_v0, %v1115_v10  ;;  %v1084_v13 = vmul.f32 %v2318_v58, %v960_v11 }
 0x17e   : > { %v1247_v14 = vmax.f32 %v1183_v12, 0.0  ;;  %v1152_v15 = vadd.f32 %v2326_v0, %v1084_v13  ;;  %v870_v16 = vpop.f32.mrf.mxu2 }
 0x17f   : > { %v1039_v17 = vpop.f32.mrf.mxu3 }
 0x180   : > { %v1311_v18 = vpack.c.bf16 %v1247_v14, %v1247_v14  ;;  %v1216_v19 = vmax.f32 %v1152_v15, 0.0  ;;  %v1040_v20 = vadd.f32 %v1039_v17, %v870_v16  ;;  %v792_v21 = vpop.f32.mrf.mxu0 }
 0x181   : > { %v961_v22 = vpop.f32.mrf.mxu1 }
 0x182   : > { %1376 = vst.msk [vmem:[%s2065_s11 + $0xe4] sm:$0xf] %vm1318_vm0, %v1311_v18  ;;  %v1280_v23 = vpack.c.bf16 %v1216_v19, %v1216_v19  ;;  %v1116_v24 = vmul.f32 %v2318_v58, %v1040_v20  ;;  %v962_v25 = vadd.f32 %v961_v22, %v792_v21 }
 0x184   : > { %1345 = vst.msk [vmem:[%s2065_s11 + $0x68] sm:$0xf] %vm1318_vm0, %v1280_v23  ;;  %v1184_v26 = vadd.f32 %v2326_v0, %v1116_v24  ;;  %v1085_v27 = vmul.f32 %v2318_v58, %v962_v25 }
 0x186   : > { %v1248_v28 = vmax.f32 %v1184_v26, 0.0  ;;  %v1153_v29 = vadd.f32 %v2326_v0, %v1085_v27  ;;  %v872_v30 = vpop.f32.mrf.mxu2 }
 0x187   : > { %v1041_v31 = vpop.f32.mrf.mxu3 }
 0x188   : > { %v1312_v32 = vpack.c.bf16 %v1248_v28, %v1248_v28  ;;  %v1217_v33 = vmax.f32 %v1153_v29, 0.0  ;;  %v1042_v34 = vadd.f32 %v1041_v31, %v872_v30  ;;  %v795_v35 = vpop.f32.mrf.mxu0 }
 0x189   : > { %v964_v36 = vpop.f32.mrf.mxu1 }
 0x18a   : > { %1377 = vst.msk [vmem:[%s2065_s11 + $0xe8] sm:$0xf] %vm1318_vm0, %v1312_v32  ;;  %v1281_v37 = vpack.c.bf16 %v1217_v33, %v1217_v33  ;;  %v1117_v38 = vmul.f32 %v2318_v58, %v1042_v34  ;;  %v965_v39 = vadd.f32 %v964_v36, %v795_v35 }
 0x18c   : > { %1346 = vst.msk [vmem:[%s2065_s11 + $0x6c] sm:$0xf] %vm1318_vm0, %v1281_v37  ;;  %v1185_v40 = vadd.f32 %v2326_v0, %v1117_v38  ;;  %v1086_v41 = vmul.f32 %v2318_v58, %v965_v39 }
 0x18e   : > { %v1249_v42 = vmax.f32 %v1185_v40, 0.0  ;;  %v1154_v43 = vadd.f32 %v2326_v0, %v1086_v41  ;;  %v875_v44 = vpop.f32.mrf.mxu2 }
 0x18f   : > { %v1044_v45 = vpop.f32.mrf.mxu3 }
 0x190   : > { %v1313_v46 = vpack.c.bf16 %v1249_v42, %v1249_v42  ;;  %v1218_v47 = vmax.f32 %v1154_v43, 0.0  ;;  %v1045_v48 = vadd.f32 %v1044_v45, %v875_v44  ;;  %v797_v49 = vpop.f32.mrf.mxu0 }
 0x191   : > { %v966_v50 = vpop.f32.mrf.mxu1 }
 0x192   : > { %1378 = vst.msk [vmem:[%s2065_s11 + $0xec] sm:$0xf] %vm1318_vm0, %v1313_v46  ;;  %v1282_v51 = vpack.c.bf16 %v1218_v47, %v1218_v47  ;;  %v1118_v52 = vmul.f32 %v2318_v58, %v1045_v48  ;;  %v967_v53 = vadd.f32 %v966_v50, %v797_v49 }
 0x194   : > { %1347 = vst.msk [vmem:[%s2065_s11 + $0x70] sm:$0xf] %vm1318_vm0, %v1282_v51  ;;  %v1186_v54 = vadd.f32 %v2326_v0, %v1118_v52  ;;  %v1087_v55 = vmul.f32 %v2318_v58, %v967_v53 }
 0x196   : > { %v1250_v56 = vmax.f32 %v1186_v54, 0.0  ;;  %v1155_v57 = vadd.f32 %v2326_v0, %v1087_v55  ;;  %v877_v59 = vpop.f32.mrf.mxu2 }
 0x197   : > { %v1046_v60 = vpop.f32.mrf.mxu3 }
 0x198   : > { %v1314_v61 = vpack.c.bf16 %v1250_v56, %v1250_v56  ;;  %v1219_v62 = vmax.f32 %v1155_v57, 0.0  ;;  %v1047_v63 = vadd.f32 %v1046_v60, %v877_v59  ;;  %v800_v1 = vpop.f32.mrf.mxu0 }
 0x199   : > { %v969_v2 = vpop.f32.mrf.mxu1 }
 0x19a   : > { %1379 = vst.msk [vmem:[%s2065_s11 + $0xf0] sm:$0xf] %vm1318_vm0, %v1314_v61  ;;  %v1283_v3 = vpack.c.bf16 %v1219_v62, %v1219_v62  ;;  %v1119_v4 = vmul.f32 %v2318_v58, %v1047_v63  ;;  %v970_v5 = vadd.f32 %v969_v2, %v800_v1 }
 0x19c   : > { %1348 = vst.msk [vmem:[%s2065_s11 + $0x74] sm:$0xf] %vm1318_vm0, %v1283_v3  ;;  %v1187_v6 = vadd.f32 %v2326_v0, %v1119_v4  ;;  %v1088_v7 = vmul.f32 %v2318_v58, %v970_v5 }
 0x19e   : > { %v1251_v8 = vmax.f32 %v1187_v6, 0.0  ;;  %v1156_v9 = vadd.f32 %v2326_v0, %v1088_v7  ;;  %v880_v10 = vpop.f32.mrf.mxu2 }
 0x19f   : > { %v1049_v11 = vpop.f32.mrf.mxu3 }
 0x1a0   : > { %v1315_v12 = vpack.c.bf16 %v1251_v8, %v1251_v8  ;;  %v1220_v13 = vmax.f32 %v1156_v9, 0.0  ;;  %v1050_v14 = vadd.f32 %v1049_v11, %v880_v10  ;;  %v802_v15 = vpop.f32.mrf.mxu0 }
 0x1a1   : > { %v971_v16 = vpop.f32.mrf.mxu1 }
 0x1a2   : > { %1380 = vst.msk [vmem:[%s2065_s11 + $0xf4] sm:$0xf] %vm1318_vm0, %v1315_v12  ;;  %v1284_v17 = vpack.c.bf16 %v1220_v13, %v1220_v13  ;;  %v1120_v18 = vmul.f32 %v2318_v58, %v1050_v14  ;;  %v972_v19 = vadd.f32 %v971_v16, %v802_v15 }
 0x1a4   : > { %1349 = vst.msk [vmem:[%s2065_s11 + $0x78] sm:$0xf] %vm1318_vm0, %v1284_v17  ;;  %v1188_v20 = vadd.f32 %v2326_v0, %v1120_v18  ;;  %v1089_v21 = vmul.f32 %v2318_v58, %v972_v19 }
 0x1a6   : > { %v1252_v22 = vmax.f32 %v1188_v20, 0.0  ;;  %v1157_v23 = vadd.f32 %v2326_v0, %v1089_v21  ;;  %v882_v24 = vpop.f32.mrf.mxu2 }
 0x1a7   : > { %v1051_v25 = vpop.f32.mrf.mxu3 }
 0x1a8   : > { %v1316_v26 = vpack.c.bf16 %v1252_v22, %v1252_v22  ;;  %v1221_v27 = vmax.f32 %v1157_v23, 0.0  ;;  %v1052_v28 = vadd.f32 %v1051_v25, %v882_v24 }
 0x1aa   : > { %1381 = vst.msk [vmem:[%s2065_s11 + $0xf8] sm:$0xf] %vm1318_vm0, %v1316_v26  ;;  %v1285_v29 = vpack.c.bf16 %v1221_v27, %v1221_v27  ;;  %v1121_v30 = vmul.f32 %v2318_v58, %v1052_v28 }
 0x1ac   : > { %1350 = vst.msk [vmem:[%s2065_s11 + $0x7c] sm:$0xf] %vm1318_vm0, %v1285_v29  ;;  %v1189_v31 = vadd.f32 %v2326_v0, %v1121_v30 }
 0x1ae   : > { %v1253_v32 = vmax.f32 %v1189_v31, 0.0 }
 0x1b0   : > { %v1317_v33 = vpack.c.bf16 %v1253_v32, %v1253_v32 }
 0x1b2   : > { %1382 = vst.msk [vmem:[%s2065_s11 + $0xfc] sm:$0xf] %vm1318_vm0, %v1317_v33 }
 0x1b3 PF: > { %s14_s15 = sadd.s32 1, %s1886_s15  }
 0x1b4   : > { %p11_p4 = scmp.ge.s32.totalorder %s14_s15, 6  }
 0x1b6   :  { %13 = sbr.rel (!%p11_p4) target bundleno = 1 (0x1), region = 66 }

// kernel: stem_forward.3
= control target key start
LH: loop header
LB: loop body
LE: loop exit
PB: predicated region body
PF: predicated region fallthrough
CT: control target
= control target key end

     0   :  { %s2083_s6 = smov 0   ;;  %s2085_s7 = smov 0   ;;  %s2384_s0 = inlined_call_operand.vmem [shape: bf16[9,256,128], index: 0, kind: input, shape index: {}]   ;;  %s2385_s1 = inlined_call_operand.vmem [shape: bf16[256,128], index: 1, kind: output, shape index: {}]  }
   0x1   :  { %s2087_s8 = smov 0  }
   0x2 LB: > { %s1477_s9 = sadd.s32 4294967295, %s2071_s8   ;;  %s2100_s10 = sadd.s32 1, %s2071_s8   ;;  %s2071_s8 = sphi %s2087_s8, %s2388_s8   ;;  %s2067_s7 = sphi %s2085_s7, %s2387_s7   ;;  %s2063_s6 = sphi %s2083_s6, %s2386_s6  }
   0x3   : > { %s15_s11 = ssub.s32 %s2071_s8, %s2100_s10  ;;  %s18_s12 = sadd.s32 1, %s2067_s7 }
   0x4   : > { %p16_p0 = scmp.eq.s32.totalorder %s15_s11, 0  ;;  %p25_p1 = scmp.ne.s32.totalorder %s2067_s7, %s2063_s6 }
   0x5   : > { %p26_p2 = scmp.eq.s32.totalorder %s2071_s8, 0  ;;  %p1480_p4 = scmp.ge.s32.totalorder %s2071_s8, 2 }
   0x6   : > { %s2109_s13 = scalar_select %p16_p0, %s2067_s7, %s18_s12  }
   0x7   : > { %p27_p3 = por %p26_p2, %p25_p1  ;;  %77 = sbr.rel (%p1480_p4) target bundleno = 88 (0x58), region = 16 }
   0xc   : > { %80 = sbr.rel (!%p27_p3) target bundleno = 88 (0x58), region = 20  ;;  %s82_s14 = sand.u32 (%p27_p3), 1, %s2067_s7  }
   0xd   : > { %s1616_s15 = sshll.u32 (%p27_p3), %s2071_s8, 6  ;;  %s2023_s16 = smul.u32 (%p27_p3), 576, %s82_s14 }
   0xe   : > { %s2117_s19 = scalar_lea.vmem (%p27_p3), %s2384_s0, %s1616_s15 }
   0xf   : > { %v104_v0 = vld [vmem:[%s2117_s19] sm:$0xff] (%p27_p3)   ;;  %v108_v1 = vld [vmem:[%s2117_s19 + $0x8] sm:$0xff] (%p27_p3)   ;;  %v112_v2 = vld [vmem:[%s2117_s19 + $0x10] sm:$0xff] (%p27_p3)   ;;  %s2122_s20 = scalar_lea.vmem (%p27_p3), [#allocation2], %s2023_s16 }
  0x10   : > { %105 = vst [vmem:[%s2122_s20] sm:$0xff] (%p27_p3), %v104_v0   ;;  %v116_v3 = vld [vmem:[%s2117_s19 + $0x18] sm:$0xff] (%p27_p3)   ;;  %v120_v4 = vld [vmem:[%s2117_s19 + $0x20] sm:$0xff] (%p27_p3)   ;;  %v124_v5 = vld [vmem:[%s2117_s19 + $0x28] sm:$0xff] (%p27_p3)  }
  0x11   : > { %109 = vst [vmem:[%s2122_s20 + $0x8] sm:$0xff] %v108_v1   ;;  %v128_v6 = vld [vmem:[%s2117_s19 + $0x30] sm:$0xff]   ;;  %v132_v7 = vld [vmem:[%s2117_s19 + $0x38] sm:$0xff]   ;;  %v136_v8 = vld [vmem:[%s2117_s19 + $0x80] sm:$0xff]  }
  0x12   : > { %113 = vst [vmem:[%s2122_s20 + $0x10] sm:$0xff] %v112_v2   ;;  %v140_v9 = vld [vmem:[%s2117_s19 + $0x88] sm:$0xff]   ;;  %v144_v10 = vld [vmem:[%s2117_s19 + $0x90] sm:$0xff]   ;;  %v148_v11 = vld [vmem:[%s2117_s19 + $0x98] sm:$0xff]  }
  0x13   : > { %117 = vst [vmem:[%s2122_s20 + $0x18] sm:$0xff] %v116_v3   ;;  %v152_v12 = vld [vmem:[%s2117_s19 + $0xa0] sm:$0xff]   ;;  %v156_v13 = vld [vmem:[%s2117_s19 + $0xa8] sm:$0xff]   ;;  %v160_v14 = vld [vmem:[%s2117_s19 + $0xb0] sm:$0xff]  }
  0x14   : > { %121 = vst [vmem:[%s2122_s20 + $0x20] sm:$0xff] %v120_v4   ;;  %v164_v15 = vld [vmem:[%s2117_s19 + $0xb8] sm:$0xff]   ;;  %v168_v16 = vld [vmem:[%s2117_s19 + $0x100] sm:$0xff]   ;;  %v172_v17 = vld [vmem:[%s2117_s19 + $0x108] sm:$0xff]  }
  0x15   : > { %125 = vst [vmem:[%s2122_s20 + $0x28] sm:$0xff] %v124_v5   ;;  %v176_v18 = vld [vmem:[%s2117_s19 + $0x110] sm:$0xff]   ;;  %v180_v19 = vld [vmem:[%s2117_s19 + $0x118] sm:$0xff]   ;;  %v184_v20 = vld [vmem:[%s2117_s19 + $0x120] sm:$0xff]  }
  0x16   : > { %129 = vst [vmem:[%s2122_s20 + $0x30] sm:$0xff] %v128_v6   ;;  %v188_v21 = vld [vmem:[%s2117_s19 + $0x128] sm:$0xff]   ;;  %v192_v22 = vld [vmem:[%s2117_s19 + $0x130] sm:$0xff]   ;;  %v196_v23 = vld [vmem:[%s2117_s19 + $0x138] sm:$0xff]  }
  0x17   : > { %133 = vst [vmem:[%s2122_s20 + $0x38] sm:$0xff] %v132_v7   ;;  %v200_v24 = vld [vmem:[%s2117_s19 + $0x180] sm:$0xff]   ;;  %v204_v25 = vld [vmem:[%s2117_s19 + $0x188] sm:$0xff]   ;;  %v208_v26 = vld [vmem:[%s2117_s19 + $0x190] sm:$0xff]  }
  0x18   : > { %137 = vst [vmem:[%s2122_s20 + $0x40] sm:$0xff] %v136_v8   ;;  %v212_v27 = vld [vmem:[%s2117_s19 + $0x198] sm:$0xff]   ;;  %v216_v28 = vld [vmem:[%s2117_s19 + $0x1a0] sm:$0xff]   ;;  %v220_v29 = vld [vmem:[%s2117_s19 + $0x1a8] sm:$0xff]  }
  0x19   : > { %141 = vst [vmem:[%s2122_s20 + $0x48] sm:$0xff] %v140_v9   ;;  %v224_v30 = vld [vmem:[%s2117_s19 + $0x1b0] sm:$0xff]   ;;  %v228_v31 = vld [vmem:[%s2117_s19 + $0x1b8] sm:$0xff]   ;;  %v232_v32 = vld [vmem:[%s2117_s19 + $0x200] sm:$0xff]  }
  0x1a   : > { %145 = vst [vmem:[%s2122_s20 + $0x50] sm:$0xff] %v144_v10   ;;  %v236_v33 = vld [vmem:[%s2117_s19 + $0x208] sm:$0xff]   ;;  %v240_v34 = vld [vmem:[%s2117_s19 + $0x210] sm:$0xff]   ;;  %v244_v35 = vld [vmem:[%s2117_s19 + $0x218] sm:$0xff]  }
  0x1b   : > { %149 = vst [vmem:[%s2122_s20 + $0x58] sm:$0xff] %v148_v11   ;;  %v248_v36 = vld [vmem:[%s2117_s19 + $0x220] sm:$0xff]   ;;  %v252_v37 = vld [vmem:[%s2117_s19 + $0x228] sm:$0xff]   ;;  %v256_v38 = vld [vmem:[%s2117_s19 + $0x230] sm:$0xff]  }
  0x1c   : > { %153 = vst [vmem:[%s2122_s20 + $0x60] sm:$0xff] %v152_v12   ;;  %v260_v39 = vld [vmem:[%s2117_s19 + $0x238] sm:$0xff]   ;;  %v264_v40 = vld [vmem:[%s2117_s19 + $0x280] sm:$0xff]   ;;  %v268_v41 = vld [vmem:[%s2117_s19 + $0x288] sm:$0xff]  }
  0x1d   : > { %157 = vst [vmem:[%s2122_s20 + $0x68] sm:$0xff] %v156_v13   ;;  %v272_v42 = vld [vmem:[%s2117_s19 + $0x290] sm:$0xff]   ;;  %v276_v43 = vld [vmem:[%s2117_s19 + $0x298] sm:$0xff]   ;;  %v280_v44 = vld [vmem:[%s2117_s19 + $0x2a0] sm:$0xff]  }
  0x1e   : > { %161 = vst [vmem:[%s2122_s20 + $0x70] sm:$0xff] %v160_v14   ;;  %v284_v45 = vld [vmem:[%s2117_s19 + $0x2a8] sm:$0xff]   ;;  %v288_v46 = vld [vmem:[%s2117_s19 + $0x2b0] sm:$0xff]   ;;  %v292_v47 = vld [vmem:[%s2117_s19 + $0x2b8] sm:$0xff]  }
  0x1f   : > { %165 = vst [vmem:[%s2122_s20 + $0x78] sm:$0xff] %v164_v15   ;;  %v296_v48 = vld [vmem:[%s2117_s19 + $0x300] sm:$0xff]   ;;  %v300_v49 = vld [vmem:[%s2117_s19 + $0x308] sm:$0xff]   ;;  %v304_v50 = vld [vmem:[%s2117_s19 + $0x310] sm:$0xff]  }
  0x20   : > { %169 = vst [vmem:[%s2122_s20 + $0x80] sm:$0xff] %v168_v16   ;;  %v308_v51 = vld [vmem:[%s2117_s19 + $0x318] sm:$0xff]   ;;  %v312_v52 = vld [vmem:[%s2117_s19 + $0x320] sm:$0xff]   ;;  %v316_v53 = vld [vmem:[%s2117_s19 + $0x328] sm:$0xff]  }
  0x21   : > { %173 = vst [vmem:[%s2122_s20 + $0x88] sm:$0xff] %v172_v17   ;;  %v320_v54 = vld [vmem:[%s2117_s19 + $0x330] sm:$0xff]   ;;  %v324_v55 = vld [vmem:[%s2117_s19 + $0x338] sm:$0xff]   ;;  %v328_v56 = vld [vmem:[%s2117_s19 + $0x380] sm:$0xff]  }
  0x22   : > { %177 = vst [vmem:[%s2122_s20 + $0x90] sm:$0xff] %v176_v18   ;;  %v332_v57 = vld [vmem:[%s2117_s19 + $0x388] sm:$0xff]   ;;  %v336_v58 = vld [vmem:[%s2117_s19 + $0x390] sm:$0xff]   ;;  %v340_v59 = vld [vmem:[%s2117_s19 + $0x398] sm:$0xff]  }
  0x23   : > { %181 = vst [vmem:[%s2122_s20 + $0x98] sm:$0xff] %v180_v19   ;;  %v344_v60 = vld [vmem:[%s2117_s19 + $0x3a0] sm:$0xff]   ;;  %v348_v61 = vld [vmem:[%s2117_s19 + $0x3a8] sm:$0xff]   ;;  %v352_v62 = vld [vmem:[%s2117_s19 + $0x3b0] sm:$0xff]  }
  0x24   : > { %185 = vst [vmem:[%s2122_s20 + $0xa0] sm:$0xff] %v184_v20   ;;  %v356_v63 = vld [vmem:[%s2117_s19 + $0x3b8] sm:$0xff]   ;;  %v360_v0 = vld [vmem:[%s2117_s19 + $0x400] sm:$0xff]   ;;  %v364_v1 = vld [vmem:[%s2117_s19 + $0x408] sm:$0xff]  }
  0x25   : > { %189 = vst [vmem:[%s2122_s20 + $0xa8] sm:$0xff] %v188_v21   ;;  %v368_v2 = vld [vmem:[%s2117_s19 + $0x410] sm:$0xff]   ;;  %v372_v3 = vld [vmem:[%s2117_s19 + $0x418] sm:$0xff]   ;;  %v376_v4 = vld [vmem:[%s2117_s19 + $0x420] sm:$0xff]  }
  0x26   : > { %193 = vst [vmem:[%s2122_s20 + $0xb0] sm:$0xff] %v192_v22   ;;  %v380_v5 = vld [vmem:[%s2117_s19 + $0x428] sm:$0xff]   ;;  %v384_v6 = vld [vmem:[%s2117_s19 + $0x430] sm:$0xff]   ;;  %v388_v7 = vld [vmem:[%s2117_s19 + $0x438] sm:$0xff]  }
  0x27   : > { %197 = vst [vmem:[%s2122_s20 + $0xb8] sm:$0xff] %v196_v23  }
  0x28   : > { %201 = vst [vmem:[%s2122_s20 + $0xc0] sm:$0xff] %v200_v24  }
  0x29   : > { %205 = vst [vmem:[%s2122_s20 + $0xc8] sm:$0xff] %v204_v25  }
  0x2a   : > { %209 = vst [vmem:[%s2122_s20 + $0xd0] sm:$0xff] %v208_v26  }
  0x2b   : > { %213 = vst [vmem:[%s2122_s20 + $0xd8] sm:$0xff] %v212_v27  }
  0x2c   : > { %217 = vst [vmem:[%s2122_s20 + $0xe0] sm:$0xff] %v216_v28  }
  0x2d   : > { %221 = vst [vmem:[%s2122_s20 + $0xe8] sm:$0xff] %v220_v29  }
  0x2e   : > { %225 = vst [vmem:[%s2122_s20 + $0xf0] sm:$0xff] %v224_v30  }
  0x2f   : > { %229 = vst [vmem:[%s2122_s20 + $0xf8] sm:$0xff] %v228_v31  }
  0x30   : > { %233 = vst [vmem:[%s2122_s20 + $0x100] sm:$0xff] %v232_v32  }
  0x31   : > { %237 = vst [vmem:[%s2122_s20 + $0x108] sm:$0xff] %v236_v33  }
  0x32   : > { %241 = vst [vmem:[%s2122_s20 + $0x110] sm:$0xff] %v240_v34  }
  0x33   : > { %245 = vst [vmem:[%s2122_s20 + $0x118] sm:$0xff] %v244_v35  }
  0x34   : > { %249 = vst [vmem:[%s2122_s20 + $0x120] sm:$0xff] %v248_v36  }
  0x35   : > { %253 = vst [vmem:[%s2122_s20 + $0x128] sm:$0xff] %v252_v37  }
  0x36   : > { %257 = vst [vmem:[%s2122_s20 + $0x130] sm:$0xff] %v256_v38  }
  0x37   : > { %261 = vst [vmem:[%s2122_s20 + $0x138] sm:$0xff] %v260_v39  }
  0x38   : > { %265 = vst [vmem:[%s2122_s20 + $0x140] sm:$0xff] %v264_v40  }
  0x39   : > { %269 = vst [vmem:[%s2122_s20 + $0x148] sm:$0xff] %v268_v41  }
  0x3a   : > { %273 = vst [vmem:[%s2122_s20 + $0x150] sm:$0xff] %v272_v42  }
  0x3b   : > { %277 = vst [vmem:[%s2122_s20 + $0x158] sm:$0xff] %v276_v43  }
  0x3c   : > { %281 = vst [vmem:[%s2122_s20 + $0x160] sm:$0xff] %v280_v44  }
  0x3d   : > { %285 = vst [vmem:[%s2122_s20 + $0x168] sm:$0xff] %v284_v45  }
  0x3e   : > { %289 = vst [vmem:[%s2122_s20 + $0x170] sm:$0xff] %v288_v46  }
  0x3f   : > { %293 = vst [vmem:[%s2122_s20 + $0x178] sm:$0xff] %v292_v47  }
  0x40   : > { %297 = vst [vmem:[%s2122_s20 + $0x180] sm:$0xff] %v296_v48  }
  0x41   : > { %301 = vst [vmem:[%s2122_s20 + $0x188] sm:$0xff] %v300_v49  }
  0x42   : > { %305 = vst [vmem:[%s2122_s20 + $0x190] sm:$0xff] %v304_v50  }
  0x43   : > { %309 = vst [vmem:[%s2122_s20 + $0x198] sm:$0xff] %v308_v51  }
  0x44   : > { %313 = vst [vmem:[%s2122_s20 + $0x1a0] sm:$0xff] %v312_v52  }
  0x45   : > { %317 = vst [vmem:[%s2122_s20 + $0x1a8] sm:$0xff] %v316_v53  }
  0x46   : > { %321 = vst [vmem:[%s2122_s20 + $0x1b0] sm:$0xff] %v320_v54  }
  0x47   : > { %325 = vst [vmem:[%s2122_s20 + $0x1b8] sm:$0xff] %v324_v55  }
  0x48   : > { %329 = vst [vmem:[%s2122_s20 + $0x1c0] sm:$0xff] %v328_v56  }
  0x49   : > { %333 = vst [vmem:[%s2122_s20 + $0x1c8] sm:$0xff] %v332_v57  }
  0x4a   : > { %337 = vst [vmem:[%s2122_s20 + $0x1d0] sm:$0xff] %v336_v58  }
  0x4b   : > { %341 = vst [vmem:[%s2122_s20 + $0x1d8] sm:$0xff] %v340_v59  }
  0x4c   : > { %345 = vst [vmem:[%s2122_s20 + $0x1e0] sm:$0xff] %v344_v60  }
  0x4d   : > { %349 = vst [vmem:[%s2122_s20 + $0x1e8] sm:$0xff] %v348_v61  }
  0x4e   : > { %353 = vst [vmem:[%s2122_s20 + $0x1f0] sm:$0xff] %v352_v62  }
  0x4f   : > { %357 = vst [vmem:[%s2122_s20 + $0x1f8] sm:$0xff] %v356_v63  }
  0x50   : > { %361 = vst [vmem:[%s2122_s20 + $0x200] sm:$0xff] %v360_v0  }
  0x51   : > { %365 = vst [vmem:[%s2122_s20 + $0x208] sm:$0xff] %v364_v1  }
  0x52   : > { %369 = vst [vmem:[%s2122_s20 + $0x210] sm:$0xff] %v368_v2  }
  0x53   : > { %373 = vst [vmem:[%s2122_s20 + $0x218] sm:$0xff] %v372_v3  }
  0x54   : > { %377 = vst [vmem:[%s2122_s20 + $0x220] sm:$0xff] %v376_v4  }
  0x55   : > { %381 = vst [vmem:[%s2122_s20 + $0x228] sm:$0xff] %v380_v5  }
  0x56   : > { %385 = vst [vmem:[%s2122_s20 + $0x230] sm:$0xff] %v384_v6  }
  0x57   : > { %389 = vst [vmem:[%s2122_s20 + $0x238] sm:$0xff] %v388_v7  }
  0x58 PF: > { %p1483_p5 = scmp.ge.s32.totalorder %s2071_s8, 1  ;;  %p702_p6 = scmp.lt.s32.totalorder %s2071_s8, 3 }
  0x5a   : > { %p703_p7 = pnand %p1483_p5, %p702_p6 }
  0x5b   : > { %s709_s21 = sand.u32 (!%p703_p7), 1, %s2063_s6   ;;  %s2286_s24 = sshll.u32 (!%p703_p7), %s1477_s9, 4 }
  0x5c   : > { %706 = sbr.rel (%p703_p7) target bundleno = 178 (0xb2), region = 61  ;;  %p730_p8 = scmp.lt.s32.totalorder (!%p703_p7), %s2286_s24, 31 }
  0x5d   : > { %s2024_s22 = smul.u32 (!%p703_p7), 576, %s709_s21 }
  0x5f   : > { %s2268_s23 = scalar_lea.vmem (!%p703_p7), [#allocation2], %s2024_s22 }
  0x61   : > { %v1618_v8 = vld [vmem:[%s2268_s23] sm:$0xff]   ;;  %v1945_v28 = vld [vmem:[%s2268_s23 + $0x8] sm:$0xff]   ;;  %s2390_s24 = smov (!%p730_p8, %s2286_s24), 31  ;;  %v1946_v5 = vld [vmem:[%s2268_s23 + $0x10] sm:$0xff]  }
  0x62   : > { %v1952_v9 = vld [vmem:[%s2268_s23 + $0x40] sm:$0xff]   ;;  %v1619_v11 = vunpack.c.l.bf16 %v1618_v8  ;;  %v1620_v12 = vunpack.c.h.bf16 %v1618_v8  ;;  %v1953_v33 = vld [vmem:[%s2268_s23 + $0x48] sm:$0xff]   ;;  %v1623_v42 = vunpack.c.l.bf16 %v1945_v28  ;;  %v1624_v43 = vunpack.c.h.bf16 %v1945_v28  ;;  %s1485_s25 = sshll.u32 %s2390_s24, 2 }
  0x63   : > { %v1960_v10 = vld [vmem:[%s2268_s23 + $0x80] sm:$0xff]   ;;  %v1651_v13 = vunpack.c.l.bf16 %v1952_v9  ;;  %v1652_v14 = vunpack.c.h.bf16 %v1952_v9  ;;  %v1961_v38 = vld [vmem:[%s2268_s23 + $0x88] sm:$0xff]   ;;  %v1655_v46 = vunpack.c.l.bf16 %v1953_v33  ;;  %v1656_v47 = vunpack.c.h.bf16 %v1953_v33  ;;  %v1978_v33 = vld [vmem:[%s2268_s23 + $0x110] sm:$0xff]   ;;  %s2315_s28 = scalar_lea.vmem %s2385_s1, %s1485_s25 }
  0x64   : > { %v1968_v15 = vld [vmem:[%s2268_s23 + $0xc0] sm:$0xff]   ;;  %v1683_v18 = vunpack.c.l.bf16 %v1960_v10  ;;  %v1684_v19 = vunpack.c.h.bf16 %v1960_v10  ;;  %v1969_v39 = vld [vmem:[%s2268_s23 + $0xc8] sm:$0xff]   ;;  %v1687_v50 = vunpack.c.l.bf16 %v1961_v38  ;;  %v1688_v51 = vunpack.c.h.bf16 %v1961_v38  ;;  %v1986_v38 = vld [vmem:[%s2268_s23 + $0x150] sm:$0xff]  }
  0x65   : > { %v1976_v16 = vld [vmem:[%s2268_s23 + $0x100] sm:$0xff]   ;;  %v1715_v20 = vunpack.c.l.bf16 %v1968_v15  ;;  %v800_v23 = vmax.f32 %v1619_v11, %v1651_v13  ;;  %v801_v24 = vmax.f32 %v1620_v12, %v1652_v14  ;;  %v1716_v25 = vunpack.c.h.bf16 %v1968_v15  ;;  %v1977_v48 = vld [vmem:[%s2268_s23 + $0x108] sm:$0xff]   ;;  %v1954_v14 = vld [vmem:[%s2268_s23 + $0x50] sm:$0xff]  }
  0x66   : > { %v1984_v17 = vld [vmem:[%s2268_s23 + $0x140] sm:$0xff]   ;;  %v1747_v26 = vunpack.c.l.bf16 %v1976_v16  ;;  %v1748_v29 = vunpack.c.h.bf16 %v1976_v16  ;;  %v1985_v49 = vld [vmem:[%s2268_s23 + $0x148] sm:$0xff]   ;;  %v1719_v52 = vunpack.c.l.bf16 %v1969_v39  ;;  %v1720_v53 = vunpack.c.h.bf16 %v1969_v39  ;;  %v1962_v15 = vld [vmem:[%s2268_s23 + $0x90] sm:$0xff]  }
  0x67   : > { %v1992_v21 = vld [vmem:[%s2268_s23 + $0x180] sm:$0xff]   ;;  %v1779_v30 = vunpack.c.l.bf16 %v1984_v17  ;;  %v1780_v31 = vunpack.c.h.bf16 %v1984_v17  ;;  %v881_v34 = vmax.f32 %v800_v23, %v1683_v18  ;;  %v882_v35 = vmax.f32 %v801_v24, %v1684_v19  ;;  %v1993_v58 = vld [vmem:[%s2268_s23 + $0x188] sm:$0xff]   ;;  %v1970_v24 = vld [vmem:[%s2268_s23 + $0xd0] sm:$0xff]  }
  0x68   : > { %v2278_v22 = vld [vmem:[%s2268_s23 + $0x1c0] sm:$0xff]   ;;  %v1811_v32 = vunpack.c.l.bf16 %v1992_v21  ;;  %v1812_v36 = vunpack.c.h.bf16 %v1992_v21  ;;  %v802_v56 = vmax.f32 %v1623_v42, %v1655_v46  ;;  %v803_v57 = vmax.f32 %v1624_v43, %v1656_v47  ;;  %v2001_v59 = vld [vmem:[%s2268_s23 + $0x1c8] sm:$0xff]   ;;  %v1994_v43 = vld [vmem:[%s2268_s23 + $0x190] sm:$0xff]  }
  0x69   : > { %v2281_v27 = vld [vmem:[%s2268_s23 + $0x200] sm:$0xff]   ;;  %v1843_v37 = vunpack.c.l.bf16 %v2278_v22  ;;  %v1844_v40 = vunpack.c.h.bf16 %v2278_v22  ;;  %v962_v44 = vmax.f32 %v881_v34, %v1715_v20  ;;  %v963_v45 = vmax.f32 %v882_v35, %v1716_v25  ;;  %v2009_v4 = vld [vmem:[%s2268_s23 + $0x208] sm:$0xff]  }
  0x6a   : > { %v1875_v41 = vunpack.c.l.bf16 %v2281_v27  ;;  %v1876_v60 = vunpack.c.h.bf16 %v2281_v27  ;;  %v1751_v61 = vunpack.c.l.bf16 %v1977_v48  ;;  %v1752_v62 = vunpack.c.h.bf16 %v1977_v48  ;;  %v2002_v48 = vld [vmem:[%s2268_s23 + $0x1d0] sm:$0xff]  }
  0x6b   : > { %v1043_v54 = vmax.f32 %v962_v44, %v1747_v26  ;;  %v1044_v55 = vmax.f32 %v963_v45, %v1748_v29  ;;  %v1783_v63 = vunpack.c.l.bf16 %v1985_v49  ;;  %v883_v2 = vmax.f32 %v802_v56, %v1687_v50 }
  0x6c   : > { %v884_v3 = vmax.f32 %v803_v57, %v1688_v51  ;;  %v1784_v6 = vunpack.c.h.bf16 %v1985_v49  ;;  %v1815_v7 = vunpack.c.l.bf16 %v1993_v58  ;;  %v1816_v8 = vunpack.c.h.bf16 %v1993_v58 }
  0x6d   : > { %v1124_v0 = vmax.f32 %v1043_v54, %v1779_v30  ;;  %v1125_v1 = vmax.f32 %v1044_v55, %v1780_v31  ;;  %v1847_v9 = vunpack.c.l.bf16 %v2001_v59  ;;  %v964_v12 = vmax.f32 %v883_v2, %v1719_v52  ;;  %v1947_v54 = vld [vmem:[%s2268_s23 + $0x18] sm:$0xff]  }
  0x6e   : > { %v965_v13 = vmax.f32 %v884_v3, %v1720_v53  ;;  %v1848_v16 = vunpack.c.h.bf16 %v2001_v59  ;;  %v1879_v17 = vunpack.c.l.bf16 %v2009_v4  ;;  %v1627_v18 = vunpack.c.l.bf16 %v1946_v5  ;;  %v2010_v53 = vld [vmem:[%s2268_s23 + $0x210] sm:$0xff]   ;;  %v1955_v59 = vld [vmem:[%s2268_s23 + $0x58] sm:$0xff]  }
  0x6f   : > { %v1205_v10 = vmax.f32 %v1124_v0, %v1811_v32  ;;  %v1206_v11 = vmax.f32 %v1125_v1, %v1812_v36  ;;  %v1628_v19 = vunpack.c.h.bf16 %v1946_v5  ;;  %v1045_v22 = vmax.f32 %v964_v12, %v1751_v61  ;;  %v1963_v0 = vld [vmem:[%s2268_s23 + $0x98] sm:$0xff]  }
  0x70   : > { %v1046_v23 = vmax.f32 %v965_v13, %v1752_v62  ;;  %v1659_v25 = vunpack.c.l.bf16 %v1954_v14  ;;  %v1660_v26 = vunpack.c.h.bf16 %v1954_v14  ;;  %v1691_v27 = vunpack.c.l.bf16 %v1962_v15  ;;  %v1971_v5 = vld [vmem:[%s2268_s23 + $0xd8] sm:$0xff]  }
  0x71   : > { %v1286_v20 = vmax.f32 %v1205_v10, %v1843_v37  ;;  %v1287_v21 = vmax.f32 %v1206_v11, %v1844_v40  ;;  %v1692_v28 = vunpack.c.h.bf16 %v1962_v15  ;;  %v1126_v31 = vmax.f32 %v1045_v22, %v1783_v63  ;;  %v1979_v10 = vld [vmem:[%s2268_s23 + $0x118] sm:$0xff]  }
  0x72   : > { %v1127_v32 = vmax.f32 %v1046_v23, %v1784_v6  ;;  %v804_v34 = vmax.f32 %v1627_v18, %v1659_v25  ;;  %v805_v35 = vmax.f32 %v1628_v19, %v1660_v26  ;;  %v1723_v36 = vunpack.c.l.bf16 %v1970_v24  ;;  %v1987_v15 = vld [vmem:[%s2268_s23 + $0x158] sm:$0xff]  }
  0x73   : > { %v1367_v29 = vmax.f32 %v1286_v20, %v1875_v41  ;;  %v1368_v30 = vmax.f32 %v1287_v21, %v1876_v60  ;;  %v1724_v37 = vunpack.c.h.bf16 %v1970_v24  ;;  %v1207_v40 = vmax.f32 %v1126_v31, %v1815_v7  ;;  %v1995_v20 = vld [vmem:[%s2268_s23 + $0x198] sm:$0xff]  }
  0x74   : > { %v1208_v41 = vmax.f32 %v1127_v32, %v1816_v8  ;;  %v1880_v42 = vunpack.c.h.bf16 %v2009_v4  ;;  %v885_v44 = vmax.f32 %v804_v34, %v1691_v27  ;;  %v886_v45 = vmax.f32 %v805_v35, %v1692_v28  ;;  %v2003_v25 = vld [vmem:[%s2268_s23 + $0x1d8] sm:$0xff]   ;;  %v1948_v35 = vld [vmem:[%s2268_s23 + $0x20] sm:$0xff]  }
  0x75   : > { %v1908_v39 = vpack.c.bf16 %v1368_v30, %v1367_v29  ;;  %v1755_v46 = vunpack.c.l.bf16 %v1978_v33  ;;  %v1756_v47 = vunpack.c.h.bf16 %v1978_v33  ;;  %v1288_v49 = vmax.f32 %v1207_v40, %v1847_v9  ;;  %v2011_v30 = vld [vmem:[%s2268_s23 + $0x218] sm:$0xff]   ;;  %v1956_v40 = vld [vmem:[%s2268_s23 + $0x60] sm:$0xff]  }
  0x76   : > { %v1289_v50 = vmax.f32 %v1208_v41, %v1848_v16  ;;  %v1787_v51 = vunpack.c.l.bf16 %v1986_v38  ;;  %v1788_v52 = vunpack.c.h.bf16 %v1986_v38  ;;  %v966_v55 = vmax.f32 %v885_v44, %v1723_v36  ;;  %v1964_v41 = vld [vmem:[%s2268_s23 + $0xa0] sm:$0xff]  }
  0x77   : > { %1909 = vst [vmem:[%s2315_s28] sm:$0xff] %v1908_v39   ;;  %v967_v56 = vmax.f32 %v886_v45, %v1724_v37  ;;  %v1819_v57 = vunpack.c.l.bf16 %v1994_v43  ;;  %v1820_v58 = vunpack.c.h.bf16 %v1994_v43  ;;  %v1369_v60 = vmax.f32 %v1288_v49, %v1879_v17 }
  0x78   : > { %v1370_v61 = vmax.f32 %v1289_v50, %v1880_v42  ;;  %v1851_v62 = vunpack.c.l.bf16 %v2002_v48  ;;  %v1852_v63 = vunpack.c.h.bf16 %v2002_v48  ;;  %v1047_v1 = vmax.f32 %v966_v55, %v1755_v46  ;;  %v1972_v50 = vld [vmem:[%s2268_s23 + $0xe0] sm:$0xff]  }
  0x79   : > { %v1048_v2 = vmax.f32 %v967_v56, %v1756_v47  ;;  %v1883_v3 = vunpack.c.l.bf16 %v2010_v53  ;;  %v1631_v4 = vunpack.c.l.bf16 %v1947_v54  ;;  %v1632_v7 = vunpack.c.h.bf16 %v1947_v54  ;;  %v1980_v55 = vld [vmem:[%s2268_s23 + $0x120] sm:$0xff]  }
  0x7a   : > { %v1913_v6 = vpack.c.bf16 %v1370_v61, %v1369_v60  ;;  %v1663_v8 = vunpack.c.l.bf16 %v1955_v59  ;;  %v1664_v9 = vunpack.c.h.bf16 %v1955_v59  ;;  %v1128_v11 = vmax.f32 %v1047_v1, %v1787_v51  ;;  %v1988_v60 = vld [vmem:[%s2268_s23 + $0x160] sm:$0xff]  }
  0x7b   : > { %v1129_v12 = vmax.f32 %v1048_v2, %v1788_v52  ;;  %v1695_v13 = vunpack.c.l.bf16 %v1963_v0  ;;  %v1696_v14 = vunpack.c.h.bf16 %v1963_v0  ;;  %v1727_v18 = vunpack.c.l.bf16 %v1971_v5  ;;  %v1996_v1 = vld [vmem:[%s2268_s23 + $0x1a0] sm:$0xff]  }
  0x7c   : > { %2016 = vst [vmem:[%s2315_s28 + $0x8] sm:$0xff] %v1913_v6   ;;  %v806_v16 = vmax.f32 %v1631_v4, %v1663_v8  ;;  %v807_v17 = vmax.f32 %v1632_v7, %v1664_v9  ;;  %v1728_v19 = vunpack.c.h.bf16 %v1971_v5  ;;  %v1209_v21 = vmax.f32 %v1128_v11, %v1819_v57  ;;  %v2004_v6 = vld [vmem:[%s2268_s23 + $0x1e0] sm:$0xff]  }
  0x7d   : > { %v1210_v22 = vmax.f32 %v1129_v12, %v1820_v58  ;;  %v1884_v23 = vunpack.c.h.bf16 %v2010_v53  ;;  %v1759_v24 = vunpack.c.l.bf16 %v1979_v10  ;;  %v1760_v28 = vunpack.c.h.bf16 %v1979_v10  ;;  %v2012_v11 = vld [vmem:[%s2268_s23 + $0x220] sm:$0xff]   ;;  %v1949_v12 = vld [vmem:[%s2268_s23 + $0x28] sm:$0xff]  }
  0x7e   : > { %v887_v26 = vmax.f32 %v806_v16, %v1695_v13  ;;  %v888_v27 = vmax.f32 %v807_v17, %v1696_v14  ;;  %v1791_v29 = vunpack.c.l.bf16 %v1987_v15  ;;  %v1290_v31 = vmax.f32 %v1209_v21, %v1851_v62  ;;  %v1957_v17 = vld [vmem:[%s2268_s23 + $0x68] sm:$0xff]  }
  0x7f   : > { %v1291_v32 = vmax.f32 %v1210_v22, %v1852_v63  ;;  %v1792_v33 = vunpack.c.h.bf16 %v1987_v15  ;;  %v1823_v34 = vunpack.c.l.bf16 %v1995_v20  ;;  %v1824_v38 = vunpack.c.h.bf16 %v1995_v20  ;;  %v1965_v22 = vld [vmem:[%s2268_s23 + $0xa8] sm:$0xff]  }
  0x80   : > { %v968_v36 = vmax.f32 %v887_v26, %v1727_v18  ;;  %v969_v37 = vmax.f32 %v888_v27, %v1728_v19  ;;  %v1855_v39 = vunpack.c.l.bf16 %v2003_v25  ;;  %v1371_v42 = vmax.f32 %v1290_v31, %v1883_v3  ;;  %v1973_v27 = vld [vmem:[%s2268_s23 + $0xe8] sm:$0xff]  }
  0x81   : > { %v1372_v43 = vmax.f32 %v1291_v32, %v1884_v23  ;;  %v1856_v44 = vunpack.c.h.bf16 %v2003_v25  ;;  %v1887_v45 = vunpack.c.l.bf16 %v2011_v30  ;;  %v1635_v48 = vunpack.c.l.bf16 %v1948_v35  ;;  %v1981_v32 = vld [vmem:[%s2268_s23 + $0x128] sm:$0xff]  }
  0x82   : > { %v1049_v46 = vmax.f32 %v968_v36, %v1759_v24  ;;  %v1050_v47 = vmax.f32 %v969_v37, %v1760_v28  ;;  %v1636_v49 = vunpack.c.h.bf16 %v1948_v35  ;;  %v1667_v52 = vunpack.c.l.bf16 %v1956_v40 }
  0x83   : > { %v1918_v51 = vpack.c.bf16 %v1372_v43, %v1371_v42  ;;  %v1668_v53 = vunpack.c.h.bf16 %v1956_v40  ;;  %v1699_v54 = vunpack.c.l.bf16 %v1964_v41  ;;  %v1888_v58 = vunpack.c.h.bf16 %v2011_v30  ;;  %v1997_v42 = vld [vmem:[%s2268_s23 + $0x1a8] sm:$0xff]  }
  0x84   : > { %v1130_v56 = vmax.f32 %v1049_v46, %v1791_v29  ;;  %v1131_v57 = vmax.f32 %v1050_v47, %v1792_v33  ;;  %v1700_v59 = vunpack.c.h.bf16 %v1964_v41  ;;  %v808_v61 = vmax.f32 %v1635_v48, %v1667_v52  ;;  %v1989_v41 = vld [vmem:[%s2268_s23 + $0x168] sm:$0xff]  }
  0x85   : > { %2017 = vst [vmem:[%s2315_s28 + $0x10] sm:$0xff] %v1918_v51   ;;  %v809_v62 = vmax.f32 %v1636_v49, %v1668_v53  ;;  %v1731_v63 = vunpack.c.l.bf16 %v1972_v50  ;;  %v1732_v0 = vunpack.c.h.bf16 %v1972_v50  ;;  %v1763_v4 = vunpack.c.l.bf16 %v1980_v55  ;;  %v2005_v51 = vld [vmem:[%s2268_s23 + $0x1e8] sm:$0xff]  }
  0x86   : > { %v1211_v2 = vmax.f32 %v1130_v56, %v1823_v34  ;;  %v1212_v3 = vmax.f32 %v1131_v57, %v1824_v38  ;;  %v1764_v5 = vunpack.c.h.bf16 %v1980_v55  ;;  %v889_v7 = vmax.f32 %v808_v61, %v1699_v54  ;;  %v2013_v52 = vld [vmem:[%s2268_s23 + $0x228] sm:$0xff]   ;;  %v1950_v57 = vld [vmem:[%s2268_s23 + $0x30] sm:$0xff]  }
  0x87   : > { %v890_v8 = vmax.f32 %v809_v62, %v1700_v59  ;;  %v1795_v9 = vunpack.c.l.bf16 %v1988_v60  ;;  %v1796_v10 = vunpack.c.h.bf16 %v1988_v60  ;;  %v1827_v15 = vunpack.c.l.bf16 %v1996_v1  ;;  %v1958_v62 = vld [vmem:[%s2268_s23 + $0x70] sm:$0xff]  }
  0x88   : > { %v1292_v13 = vmax.f32 %v1211_v2, %v1855_v39  ;;  %v1293_v14 = vmax.f32 %v1212_v3, %v1856_v44  ;;  %v1828_v16 = vunpack.c.h.bf16 %v1996_v1  ;;  %v970_v18 = vmax.f32 %v889_v7, %v1731_v63  ;;  %v1966_v3 = vld [vmem:[%s2268_s23 + $0xb0] sm:$0xff]  }
  0x89   : > { %v971_v19 = vmax.f32 %v890_v8, %v1732_v0  ;;  %v1859_v20 = vunpack.c.l.bf16 %v2004_v6  ;;  %v1860_v21 = vunpack.c.h.bf16 %v2004_v6  ;;  %v1891_v25 = vunpack.c.l.bf16 %v2012_v11  ;;  %v1974_v8 = vld [vmem:[%s2268_s23 + $0xf0] sm:$0xff]  }
  0x8a   : > { %v1373_v23 = vmax.f32 %v1292_v13, %v1887_v45  ;;  %v1374_v24 = vmax.f32 %v1293_v14, %v1888_v58  ;;  %v1639_v26 = vunpack.c.l.bf16 %v1949_v12  ;;  %v1051_v28 = vmax.f32 %v970_v18, %v1763_v4  ;;  %v1982_v13 = vld [vmem:[%s2268_s23 + $0x130] sm:$0xff]  }
  0x8b   : > { %v1052_v29 = vmax.f32 %v971_v19, %v1764_v5  ;;  %v1640_v30 = vunpack.c.h.bf16 %v1949_v12  ;;  %v1671_v31 = vunpack.c.l.bf16 %v1957_v17  ;;  %v1672_v34 = vunpack.c.h.bf16 %v1957_v17 }
  0x8c   : > { %v1923_v33 = vpack.c.bf16 %v1374_v24, %v1373_v23  ;;  %v1703_v35 = vunpack.c.l.bf16 %v1965_v22  ;;  %v1704_v36 = vunpack.c.h.bf16 %v1965_v22  ;;  %v1132_v37 = vmax.f32 %v1051_v28, %v1795_v9  ;;  %v1990_v22 = vld [vmem:[%s2268_s23 + $0x170] sm:$0xff]  }
  0x8d   : > { %v1133_v38 = vmax.f32 %v1052_v29, %v1796_v10  ;;  %v810_v39 = vmax.f32 %v1639_v26, %v1671_v31  ;;  %v1735_v40 = vunpack.c.l.bf16 %v1973_v27  ;;  %v1892_v43 = vunpack.c.h.bf16 %v2012_v11 }
  0x8e   : > { %2018 = vst [vmem:[%s2315_s28 + $0x18] sm:$0xff] %v1923_v33   ;;  %v811_v44 = vmax.f32 %v1640_v30, %v1672_v34  ;;  %v1736_v45 = vunpack.c.h.bf16 %v1973_v27  ;;  %v1767_v46 = vunpack.c.l.bf16 %v1981_v32  ;;  %v1213_v47 = vmax.f32 %v1132_v37, %v1827_v15  ;;  %v1998_v27 = vld [vmem:[%s2268_s23 + $0x1b0] sm:$0xff]  }
  0x8f   : > { %v1214_v48 = vmax.f32 %v1133_v38, %v1828_v16  ;;  %v891_v49 = vmax.f32 %v810_v39, %v1703_v35  ;;  %v1768_v50 = vunpack.c.h.bf16 %v1981_v32  ;;  %v1799_v54 = vunpack.c.l.bf16 %v1989_v41  ;;  %v2006_v32 = vld [vmem:[%s2268_s23 + $0x1f0] sm:$0xff]  }
  0x90   : > { %v892_v53 = vmax.f32 %v811_v44, %v1704_v36  ;;  %v1800_v55 = vunpack.c.h.bf16 %v1989_v41  ;;  %v1831_v56 = vunpack.c.l.bf16 %v1997_v42  ;;  %v1294_v58 = vmax.f32 %v1213_v47, %v1859_v20  ;;  %v1951_v36 = vld [vmem:[%s2268_s23 + $0x38] sm:$0xff]  }
  0x91   : > { %v1295_v59 = vmax.f32 %v1214_v48, %v1860_v21  ;;  %v972_v60 = vmax.f32 %v891_v49, %v1735_v40  ;;  %v1832_v61 = vunpack.c.h.bf16 %v1997_v42  ;;  %v1863_v0 = vunpack.c.l.bf16 %v2005_v51  ;;  %v1959_v41 = vld [vmem:[%s2268_s23 + $0x78] sm:$0xff]  }
  0x92   : > { %v973_v63 = vmax.f32 %v892_v53, %v1736_v45  ;;  %v1864_v1 = vunpack.c.h.bf16 %v2005_v51  ;;  %v1895_v2 = vunpack.c.l.bf16 %v2013_v52  ;;  %v1375_v4 = vmax.f32 %v1294_v58, %v1891_v25  ;;  %v1967_v42 = vld [vmem:[%s2268_s23 + $0xb8] sm:$0xff]  }
  0x93   : > { %v1376_v5 = vmax.f32 %v1295_v59, %v1892_v43  ;;  %v1053_v6 = vmax.f32 %v972_v60, %v1767_v46  ;;  %v1643_v7 = vunpack.c.l.bf16 %v1950_v57  ;;  %v1644_v10 = vunpack.c.h.bf16 %v1950_v57  ;;  %v1975_v51 = vld [vmem:[%s2268_s23 + $0xf8] sm:$0xff]  }
  0x94   : > { %v1054_v9 = vmax.f32 %v973_v63, %v1768_v50  ;;  %v1675_v11 = vunpack.c.l.bf16 %v1958_v62  ;;  %v1676_v12 = vunpack.c.h.bf16 %v1958_v62  ;;  %v1707_v16 = vunpack.c.l.bf16 %v1966_v3 }
  0x95   : > { %v1928_v14 = vpack.c.bf16 %v1376_v5, %v1375_v4  ;;  %v1134_v15 = vmax.f32 %v1053_v6, %v1799_v54  ;;  %v1708_v17 = vunpack.c.h.bf16 %v1966_v3  ;;  %v1739_v21 = vunpack.c.l.bf16 %v1974_v8  ;;  %v1991_v6 = vld [vmem:[%s2268_s23 + $0x178] sm:$0xff]  }
  0x96   : > { %v1135_v18 = vmax.f32 %v1054_v9, %v1800_v55  ;;  %v812_v19 = vmax.f32 %v1643_v7, %v1675_v11  ;;  %v813_v20 = vmax.f32 %v1644_v10, %v1676_v12  ;;  %v1896_v24 = vunpack.c.h.bf16 %v2013_v52  ;;  %v2014_v52 = vld [vmem:[%s2268_s23 + $0x230] sm:$0xff]  }
  0x97   : > { %2019 = vst [vmem:[%s2315_s28 + $0x20] sm:$0xff] %v1928_v14   ;;  %v1215_v23 = vmax.f32 %v1134_v15, %v1831_v56  ;;  %v1740_v25 = vunpack.c.h.bf16 %v1974_v8  ;;  %v1771_v26 = vunpack.c.l.bf16 %v1982_v13  ;;  %v1772_v31 = vunpack.c.h.bf16 %v1982_v13  ;;  %v1999_v13 = vld [vmem:[%s2268_s23 + $0x1b8] sm:$0xff]  }
  0x98   : > { %v1216_v28 = vmax.f32 %v1135_v18, %v1832_v61  ;;  %v893_v29 = vmax.f32 %v812_v19, %v1707_v16  ;;  %v894_v30 = vmax.f32 %v813_v20, %v1708_v17  ;;  %v1803_v34 = vunpack.c.l.bf16 %v1990_v22  ;;  %v1983_v61 = vld [vmem:[%s2268_s23 + $0x138] sm:$0xff]  }
  0x99   : > { %v1296_v33 = vmax.f32 %v1215_v23, %v1863_v0  ;;  %v1804_v35 = vunpack.c.h.bf16 %v1990_v22  ;;  %v1835_v40 = vunpack.c.l.bf16 %v1998_v27  ;;  %v1836_v44 = vunpack.c.h.bf16 %v1998_v27  ;;  %v2007_v20 = vld [vmem:[%s2268_s23 + $0x1f8] sm:$0xff]  }
  0x9a   : > { %v1297_v37 = vmax.f32 %v1216_v28, %v1864_v1  ;;  %v974_v38 = vmax.f32 %v893_v29, %v1739_v21  ;;  %v975_v39 = vmax.f32 %v894_v30, %v1740_v25  ;;  %v1867_v45 = vunpack.c.l.bf16 %v2006_v32 }
  0x9b   : > { %v1377_v43 = vmax.f32 %v1296_v33, %v1895_v2  ;;  %v1868_v46 = vunpack.c.h.bf16 %v2006_v32  ;;  %v1647_v50 = vunpack.c.l.bf16 %v1951_v36  ;;  %v1648_v53 = vunpack.c.h.bf16 %v1951_v36 }
  0x9c   : > { %v1378_v47 = vmax.f32 %v1297_v37, %v1896_v24  ;;  %v1055_v48 = vmax.f32 %v974_v38, %v1771_v26  ;;  %v1056_v49 = vmax.f32 %v975_v39, %v1772_v31  ;;  %v1679_v54 = vunpack.c.l.bf16 %v1959_v41  ;;  %v2015_v26 = vld [vmem:[%s2268_s23 + $0x238] sm:$0xff]  }
  0x9d   : > { %v1680_v55 = vunpack.c.h.bf16 %v1959_v41  ;;  %v1711_v56 = vunpack.c.l.bf16 %v1967_v42  ;;  %v1712_v60 = vunpack.c.h.bf16 %v1967_v42  ;;  %v1743_v0 = vunpack.c.l.bf16 %v1975_v51 }
  0x9e   : > { %v1933_v57 = vpack.c.bf16 %v1378_v47, %v1377_v43  ;;  %v1136_v58 = vmax.f32 %v1055_v48, %v1803_v34  ;;  %v1137_v59 = vmax.f32 %v1056_v49, %v1804_v35  ;;  %v814_v62 = vmax.f32 %v1647_v50, %v1679_v54 }
  0x9f   : > { %v815_v63 = vmax.f32 %v1648_v53, %v1680_v55  ;;  %v1744_v1 = vunpack.c.h.bf16 %v1975_v51  ;;  %v1899_v4 = vunpack.c.l.bf16 %v2014_v52  ;;  %v1900_v5 = vunpack.c.h.bf16 %v2014_v52 }
  0xa0   : > { %2020 = vst [vmem:[%s2315_s28 + $0x28] sm:$0xff] %v1933_v57   ;;  %v1217_v2 = vmax.f32 %v1136_v58, %v1835_v40  ;;  %v1218_v3 = vmax.f32 %v1137_v59, %v1836_v44  ;;  %v895_v7 = vmax.f32 %v814_v62, %v1711_v56  ;;  %v1775_v9 = vunpack.c.l.bf16 %v1983_v61 }
  0xa1   : > { %v896_v8 = vmax.f32 %v815_v63, %v1712_v60  ;;  %v1776_v10 = vunpack.c.h.bf16 %v1983_v61  ;;  %v1807_v16 = vunpack.c.l.bf16 %v1991_v6  ;;  %v1808_v17 = vunpack.c.h.bf16 %v1991_v6 }
  0xa2   : > { %v1298_v11 = vmax.f32 %v1217_v2, %v1867_v45  ;;  %v1299_v12 = vmax.f32 %v1218_v3, %v1868_v46  ;;  %v976_v14 = vmax.f32 %v895_v7, %v1743_v0  ;;  %v1839_v23 = vunpack.c.l.bf16 %v1999_v13 }
  0xa3   : > { %v977_v15 = vmax.f32 %v896_v8, %v1744_v1  ;;  %v1840_v24 = vunpack.c.h.bf16 %v1999_v13  ;;  %v1871_v29 = vunpack.c.l.bf16 %v2007_v20  ;;  %v1872_v30 = vunpack.c.h.bf16 %v2007_v20 }
  0xa4   : > { %v1379_v18 = vmax.f32 %v1298_v11, %v1899_v4  ;;  %v1380_v19 = vmax.f32 %v1299_v12, %v1900_v5  ;;  %v1057_v21 = vmax.f32 %v976_v14, %v1775_v9  ;;  %v1903_v33 = vunpack.c.l.bf16 %v2015_v26 }
  0xa5   : > { %v1058_v22 = vmax.f32 %v977_v15, %v1776_v10  ;;  %v1904_v34 = vunpack.c.h.bf16 %v2015_v26 }
  0xa6   : > { %v1938_v25 = vpack.c.bf16 %v1380_v19, %v1379_v18  ;;  %v1138_v27 = vmax.f32 %v1057_v21, %v1807_v16 }
  0xa7   : > { %v1139_v28 = vmax.f32 %v1058_v22, %v1808_v17 }
  0xa8   : > { %2021 = vst [vmem:[%s2315_s28 + $0x30] sm:$0xff] %v1938_v25   ;;  %v1219_v31 = vmax.f32 %v1138_v27, %v1839_v23 }
  0xa9   : > { %v1220_v32 = vmax.f32 %v1139_v28, %v1840_v24 }
  0xaa   : > { %v1300_v35 = vmax.f32 %v1219_v31, %v1871_v29 }
  0xab   : > { %v1301_v36 = vmax.f32 %v1220_v32, %v1872_v30 }
  0xac   : > { %v1381_v37 = vmax.f32 %v1300_v35, %v1903_v33 }
  0xad   : > { %v1382_v38 = vmax.f32 %v1301_v36, %v1904_v34 }
  0xaf   : > { %v1943_v39 = vpack.c.bf16 %v1382_v38, %v1381_v37 }
  0xb1   : > { %2022 = vst [vmem:[%s2315_s28 + $0x38] sm:$0xff] %v1943_v39  }
  0xb2 PF: > { %p8_p9 = scmp.ge.s32.totalorder %s2100_s10, 4   ;;  %s2386_s6 = smov %s2067_s7 }
  0xb3   : > { %s2387_s7 = smov %s2109_s13  ;;  %s2388_s8 = smov %s2100_s10 }
  0xb4   :  { %10 = sbr.rel (!%p8_p9) target bundleno = 2 (0x2), region = 108 }

</bundles_post_ra>
